<compile_context>
chip_gen: v5e
topology: v5e:2x2
jax: 0.10.0
libtpu: 0.0.40
codegen_flags: <defaults>
</compile_context>

<pallas_src>
from functools import partial

import jax
import jax.numpy as jnp
from jax.experimental import pallas as pl
from jax.experimental.pallas import tpu as pltpu


def _upsample_fused_kernel(x_ref, w_ref, b_ref, e_ref, o_ref):
    """1x1 conv + PixelShuffle(2) for one (batch, row-tile) block.

    x_ref: (C_in, TH, W)    VMEM  input rows, W on lanes
    w_ref: (C_out, C_in)    SMEM  conv weights (scalar reads)
    b_ref: (C_out,)         SMEM  conv bias
    e_ref: (2, CK, 2*CK)    VMEM  0/1 scatter matrices (E0: w->2w, E1: w->2w+1)
    o_ref: (Cs, TH, 4*W)    VMEM  view of the final (Cs, 2H, 2W) output:
                                   o[c, t, i*2W + q] == y[c, 2*(t0+t) + i, q]
    """
    c_in, _, w_dim = x_ref.shape
    cs = o_ref.shape[0]
    ck = e_ref.shape[1]
    n_chunks = w_dim // ck

    e0 = e_ref[0]
    e1 = e_ref[1]

    # Load each input channel once; all conv math in f32 (safe on v5e's VPU).
    xs = [x_ref[k].astype(jnp.float32) for k in range(c_in)]

    # Static unroll over the Cs * 2 output row-parity pairs (PixelShuffle r == 2).
    for c in range(cs):
        for i in range(2):
            oa = 4 * c + 2 * i      # feat channel -> even output columns (j == 0)
            ob = oa + 1             # feat channel -> odd  output columns (j == 1)
            # Unrolled VPU MAC; bias folded into the first term (no zeros-init,
            # no separate bias add).
            fa = w_ref[oa, 0] * xs[0] + b_ref[oa]
            fb = w_ref[ob, 0] * xs[0] + b_ref[ob]
            for k in range(1, c_in):
                fa = fa + w_ref[oa, k] * xs[k]
                fb = fb + w_ref[ob, k] * xs[k]
            # j-interleave: out[t, 2w+j] = f_j[t, w].  Done as exact 0/1 scatter
            # matmuls on the otherwise-idle MXU, 128 input lanes per chunk; the
            # result vregs are stored directly into the output block.
            for q in range(n_chunks):
                a_q = fa[:, q * ck:(q + 1) * ck]
                b_q = fb[:, q * ck:(q + 1) * ck]
                row = (jnp.dot(a_q, e0, preferred_element_type=jnp.float32)
                       + jnp.dot(b_q, e1, preferred_element_type=jnp.float32))
                start = i * 2 * w_dim + q * 2 * ck
                o_ref[c, :, start:start + 2 * ck] = row.astype(o_ref.dtype)


def _pick_row_tile(H, W, N, target_pixels):
    """Largest divisor-of-H row tile (multiple of 8, or H itself) with at most
    `target_pixels` pixels, keeping >= 2 grid steps so both v7x TCs get work."""
    divs = [d for d in range(1, H + 1) if H % d == 0 and (d % 8 == 0 or d == H)]
    fitting = [d for d in divs if d * W <= target_pixels]
    th = max(fitting) if fitting else min(divs)
    if N * (H // th) < 2:                      # megacore: keep >= 2 parallel steps
        smaller = [d for d in divs if d < th]
        if smaller:
            th = max(smaller)
    return th


def upsample_pallas(x_nchw, w, b, *, out_dtype=None, target_pixels=4096):
    """y = PixelShuffle(2)(Conv2d(C_in, C_out, 1)(x)), fused into one kernel.

    x_nchw: (N, C_in, H, W)
    w:      (C_out, C_in) or (C_out, C_in, 1, 1)    (torch Conv2d weight layout)
    b:      (C_out,)
    returns (N, C_out // 4, 2H, 2W) in `out_dtype` (default x.dtype; pass
    jnp.bfloat16 to halve the dominant HBM write while keeping f32 compute).
    """
    N, C_in, H, W = x_nchw.shape
    w2 = jnp.reshape(w, (w.shape[0], -1)).astype(jnp.float32)
    C_out = w2.shape[0]
    assert w2.shape[1] == C_in, (w.shape, x_nchw.shape)
    r = 2                                       # nn.PixelShuffle(2), hardcoded in the module
    assert C_out % (r * r) == 0
    Cs = C_out // (r * r)
    out_dtype = x_nchw.dtype if out_dtype is None else jnp.dtype(out_dtype)

    TH = _pick_row_tile(H, W, N, target_pixels)
    CK = 128 if W % 128 == 0 else W             # lane-chunk of the j-interleave scatter

    # Exact 0/1 scatter matrices: E0[w, 2w] = 1, E1[w, 2w+1] = 1.
    col = jnp.arange(2 * CK)[None, :]
    row = jnp.arange(CK)[:, None]
    e = jnp.stack([(col == 2 * row).astype(jnp.float32),
                   (col == 2 * row + 1).astype(jnp.float32)], axis=0)

    grid = (N, H // TH)
    in_bytes = N * C_in * H * W * x_nchw.dtype.itemsize
    out_bytes = N * Cs * H * 4 * W * out_dtype.itemsize

    out_view = pl.pallas_call(
        _upsample_fused_kernel,
        out_shape=jax.ShapeDtypeStruct((N, Cs, H, 4 * W), out_dtype),
        grid_spec=pltpu.PrefetchScalarGridSpec(
            num_scalar_prefetch=0,
            grid=grid,
            in_specs=[
                pl.BlockSpec((None, C_in, TH, W), lambda n, t: (n, 0, t, 0)),
                pl.BlockSpec(memory_space=pltpu.MemorySpace.SMEM),   # weights
                pl.BlockSpec(memory_space=pltpu.MemorySpace.SMEM),   # bias
                pl.BlockSpec((2, CK, 2 * CK), lambda n, t: (0, 0, 0)),
            ],
            out_specs=pl.BlockSpec((None, Cs, TH, 4 * W), lambda n, t: (n, 0, t, 0)),
        ),
        compiler_params=pltpu.CompilerParams(
            dimension_semantics=("parallel", "parallel"),
        ),
        cost_estimate=pl.CostEstimate(
            flops=2 * N * H * W * C_out * (C_in + CK),   # conv MACs + scatter matmuls
            transcendentals=0,
            bytes_accessed=in_bytes + out_bytes,
        ),
    )(x_nchw, w2, b.astype(jnp.float32), e)

    # Free (contiguous) reshape: (N, Cs, H, 4W) is the row-major view of (N, Cs, 2H, 2W).
    return out_view.reshape(N, Cs, r * H, r * W)


@partial(jax.jit, static_argnames=("factor",))
def upsample_forward(x_nchw, w, b, factor=2):
    """UpSample.forward.  NOTE: faithful to the PyTorch module, PixelShuffle is
    hardcoded to 2 even though the conv widens channels by factor**2 (the module
    only makes sense for factor=2)."""
    N, C, H, W = x_nchw.shape
    C_out = w.shape[0]
    assert C_out == C * factor * factor, "proj widens channels by factor**2"
    return upsample_pallas(x_nchw, w, b)


def _reference(x_nchw, w, b):
    # Pure-JAX reference for the correctness check.
    feat = jnp.einsum("nihw,oi->nohw", x_nchw, w) + b[None, :, None, None]
    N, C_out, H, W = feat.shape
    r = 2
    Cs = C_out // (r * r)
    f = feat.reshape(N, Cs, r, r, H, W)
    f = jnp.transpose(f, (0, 1, 4, 2, 5, 3))
    return f.reshape(N, Cs, H * r, W * r)


if __name__ == "__main__":
    key = jax.random.PRNGKey(0)
    k1, k2, k3 = jax.random.split(key, 3)

    N, C, H, W = 2, 4, 16, 16
    factor = 2
    C_out = C * factor * factor  # 16

    x = jax.random.normal(k1, (N, C, H, W), dtype=jnp.float32)
    # torch Conv2d(n_chan, out_chan, 1) weight is (out_chan, in_chan, 1, 1);
    # stored here directly as (out_chan, in_chan).
    w = jax.random.normal(k2, (C_out, C), dtype=jnp.float32) * 0.1
    b = jax.random.normal(k3, (C_out,), dtype=jnp.float32) * 0.1

    out = jax.block_until_ready(upsample_forward(x, w, b, factor=factor))
    ref = _reference(x, w, b)

    assert out.shape == (N, C, 2 * H, 2 * W), out.shape
    # Tolerance note: the conv MAC is exact f32 on the VPU; the only possible
    # deviation is MXU f32-pass rounding in the 0/1 scatter matmul (and the
    # reference einsum's own matmul precision), both bounded far below 5e-3 at
    # these magnitudes, while any indexing/shuffle bug would show O(0.1-1) errors.
    assert jnp.allclose(out, ref, atol=5e-3, rtol=5e-3), (
        "mismatch vs reference, max |diff| = %g"
        % float(jnp.max(jnp.abs(out - ref))))
    print("KERNEL_OK")
</pallas_src>

<mosaic_0001>
module attributes {stable_mosaic.version = 11 : i64} {
  func.func @_upsample_fused_kernel(%arg0: i32, %arg1: i32, %arg2: memref<1x4x16x16xf32, #tpu.memory_space<vmem>>, %arg3: memref<16x4xf32, #tpu.memory_space<smem>>, %arg4: memref<16xf32, #tpu.memory_space<smem>>, %arg5: memref<2x16x32xf32, #tpu.memory_space<vmem>>, %arg6: memref<1x4x16x64xf32, #tpu.memory_space<vmem>>) attributes {dimension_semantics = [#tpu.dimension_semantics<parallel>, #tpu.dimension_semantics<parallel>], iteration_bounds = array<i64: 2, 1>, scalar_prefetch = 0 : i64, scratch_operands = 0 : i64, tpu.core_type = #tpu.core_type<tc>, window_params = [{transform_indices = @transform_0, window_bounds = array<i64: 1, 4, 16, 16>}, {transform_indices = @transform_1, window_bounds = array<i64: 16, 4>}, {transform_indices = @transform_2, window_bounds = array<i64: 16>}, {pipeline_mode = #tpu.pipeline_mode<synchronous>, transform_indices = @transform_3, window_bounds = array<i64: 2, 16, 32>}, {transform_indices = @transform_4, window_bounds = array<i64: 1, 4, 16, 64>}]} {
    %c0 = arith.constant 0 : index
    %c0_0 = arith.constant 0 : index
    %c0_1 = arith.constant 0 : index
    %0 = vector.load %arg5[%c0, %c0_0, %c0_1] : memref<2x16x32xf32, #tpu.memory_space<vmem>>, vector<1x16x32xf32>
    %1 = vector.shape_cast %0 : vector<1x16x32xf32> to vector<16x32xf32>
    %c1 = arith.constant 1 : index
    %c0_2 = arith.constant 0 : index
    %c0_3 = arith.constant 0 : index
    %2 = vector.load %arg5[%c1, %c0_2, %c0_3] : memref<2x16x32xf32, #tpu.memory_space<vmem>>, vector<1x16x32xf32>
    %3 = vector.shape_cast %2 : vector<1x16x32xf32> to vector<16x32xf32>
    %c0_4 = arith.constant 0 : index
    %c0_5 = arith.constant 0 : index
    %c0_6 = arith.constant 0 : index
    %c0_7 = arith.constant 0 : index
    %4 = vector.load %arg2[%c0_4, %c0_5, %c0_6, %c0_7] : memref<1x4x16x16xf32, #tpu.memory_space<vmem>>, vector<1x1x16x16xf32>
    %5 = vector.shape_cast %4 : vector<1x1x16x16xf32> to vector<16x16xf32>
    %c0_8 = arith.constant 0 : index
    %c1_9 = arith.constant 1 : index
    %c0_10 = arith.constant 0 : index
    %c0_11 = arith.constant 0 : index
    %6 = vector.load %arg2[%c0_8, %c1_9, %c0_10, %c0_11] : memref<1x4x16x16xf32, #tpu.memory_space<vmem>>, vector<1x1x16x16xf32>
    %7 = vector.shape_cast %6 : vector<1x1x16x16xf32> to vector<16x16xf32>
    %c0_12 = arith.constant 0 : index
    %c2 = arith.constant 2 : index
    %c0_13 = arith.constant 0 : index
    %c0_14 = arith.constant 0 : index
    %8 = vector.load %arg2[%c0_12, %c2, %c0_13, %c0_14] : memref<1x4x16x16xf32, #tpu.memory_space<vmem>>, vector<1x1x16x16xf32>
    %9 = vector.shape_cast %8 : vector<1x1x16x16xf32> to vector<16x16xf32>
    %c0_15 = arith.constant 0 : index
    %c3 = arith.constant 3 : index
    %c0_16 = arith.constant 0 : index
    %c0_17 = arith.constant 0 : index
    %10 = vector.load %arg2[%c0_15, %c3, %c0_16, %c0_17] : memref<1x4x16x16xf32, #tpu.memory_space<vmem>>, vector<1x1x16x16xf32>
    %11 = vector.shape_cast %10 : vector<1x1x16x16xf32> to vector<16x16xf32>
    %c0_18 = arith.constant 0 : index
    %c0_19 = arith.constant 0 : index
    %12 = memref.load %arg3[%c0_18, %c0_19] : memref<16x4xf32, #tpu.memory_space<smem>>
    %13 = vector.broadcast %12 : f32 to vector<16x16xf32>
    %14 = arith.mulf %13, %5 : vector<16x16xf32>
    %c0_20 = arith.constant 0 : index
    %15 = memref.load %arg4[%c0_20] : memref<16xf32, #tpu.memory_space<smem>>
    %16 = vector.broadcast %15 : f32 to vector<16x16xf32>
    %17 = arith.addf %14, %16 : vector<16x16xf32>
    %c1_21 = arith.constant 1 : index
    %c0_22 = arith.constant 0 : index
    %18 = memref.load %arg3[%c1_21, %c0_22] : memref<16x4xf32, #tpu.memory_space<smem>>
    %19 = vector.broadcast %18 : f32 to vector<16x16xf32>
    %20 = arith.mulf %19, %5 : vector<16x16xf32>
    %c1_23 = arith.constant 1 : index
    %21 = memref.load %arg4[%c1_23] : memref<16xf32, #tpu.memory_space<smem>>
    %22 = vector.broadcast %21 : f32 to vector<16x16xf32>
    %23 = arith.addf %20, %22 : vector<16x16xf32>
    %c0_24 = arith.constant 0 : index
    %c1_25 = arith.constant 1 : index
    %24 = memref.load %arg3[%c0_24, %c1_25] : memref<16x4xf32, #tpu.memory_space<smem>>
    %25 = vector.broadcast %24 : f32 to vector<16x16xf32>
    %26 = arith.mulf %25, %7 : vector<16x16xf32>
    %27 = arith.addf %17, %26 : vector<16x16xf32>
    %c1_26 = arith.constant 1 : index
    %c1_27 = arith.constant 1 : index
    %28 = memref.load %arg3[%c1_26, %c1_27] : memref<16x4xf32, #tpu.memory_space<smem>>
    %29 = vector.broadcast %28 : f32 to vector<16x16xf32>
    %30 = arith.mulf %29, %7 : vector<16x16xf32>
    %31 = arith.addf %23, %30 : vector<16x16xf32>
    %c0_28 = arith.constant 0 : index
    %c2_29 = arith.constant 2 : index
    %32 = memref.load %arg3[%c0_28, %c2_29] : memref<16x4xf32, #tpu.memory_space<smem>>
    %33 = vector.broadcast %32 : f32 to vector<16x16xf32>
    %34 = arith.mulf %33, %9 : vector<16x16xf32>
    %35 = arith.addf %27, %34 : vector<16x16xf32>
    %c1_30 = arith.constant 1 : index
    %c2_31 = arith.constant 2 : index
    %36 = memref.load %arg3[%c1_30, %c2_31] : memref<16x4xf32, #tpu.memory_space<smem>>
    %37 = vector.broadcast %36 : f32 to vector<16x16xf32>
    %38 = arith.mulf %37, %9 : vector<16x16xf32>
    %39 = arith.addf %31, %38 : vector<16x16xf32>
    %c0_32 = arith.constant 0 : index
    %c3_33 = arith.constant 3 : index
    %40 = memref.load %arg3[%c0_32, %c3_33] : memref<16x4xf32, #tpu.memory_space<smem>>
    %41 = vector.broadcast %40 : f32 to vector<16x16xf32>
    %42 = arith.mulf %41, %11 : vector<16x16xf32>
    %43 = arith.addf %35, %42 : vector<16x16xf32>
    %c1_34 = arith.constant 1 : index
    %c3_35 = arith.constant 3 : index
    %44 = memref.load %arg3[%c1_34, %c3_35] : memref<16x4xf32, #tpu.memory_space<smem>>
    %45 = vector.broadcast %44 : f32 to vector<16x16xf32>
    %46 = arith.mulf %45, %11 : vector<16x16xf32>
    %47 = arith.addf %39, %46 : vector<16x16xf32>
    %cst = arith.constant dense<0.000000e+00> : vector<16x32xf32>
    %48 = tpu.matmul %43, %1, %cst {dimension_numbers = #tpu.dot_dimension_numbers<[1], [0], [0], [1], [0, 0, 1, 1], [], []>} : vector<16x16xf32>, vector<16x32xf32>, vector<16x32xf32> -> vector<16x32xf32>
    %cst_36 = arith.constant dense<0.000000e+00> : vector<16x32xf32>
    %49 = tpu.matmul %47, %3, %cst_36 {dimension_numbers = #tpu.dot_dimension_numbers<[1], [0], [0], [1], [0, 0, 1, 1], [], []>} : vector<16x16xf32>, vector<16x32xf32>, vector<16x32xf32> -> vector<16x32xf32>
    %50 = arith.addf %48, %49 : vector<16x32xf32>
    %c0_37 = arith.constant 0 : index
    %c0_38 = arith.constant 0 : index
    %c0_39 = arith.constant 0 : index
    %c0_40 = arith.constant 0 : index
    %51 = vector.load %arg6[%c0_37, %c0_38, %c0_39, %c0_40] : memref<1x4x16x64xf32, #tpu.memory_space<vmem>>, vector<1x1x16x32xf32>
    %52 = vector.shape_cast %51 : vector<1x1x16x32xf32> to vector<16x32xf32>
    %53 = vector.shape_cast %50 : vector<16x32xf32> to vector<1x1x16x32xf32>
    tpu.vector_store %arg6[%c0_37, %c0_38, %c0_39, %c0_40], %53 {strides = array<i32>} : memref<1x4x16x64xf32, #tpu.memory_space<vmem>>, vector<1x1x16x32xf32>,
    %c2_41 = arith.constant 2 : index
    %c0_42 = arith.constant 0 : index
    %54 = memref.load %arg3[%c2_41, %c0_42] : memref<16x4xf32, #tpu.memory_space<smem>>
    %55 = vector.broadcast %54 : f32 to vector<16x16xf32>
    %56 = arith.mulf %55, %5 : vector<16x16xf32>
    %c2_43 = arith.constant 2 : index
    %57 = memref.load %arg4[%c2_43] : memref<16xf32, #tpu.memory_space<smem>>
    %58 = vector.broadcast %57 : f32 to vector<16x16xf32>
    %59 = arith.addf %56, %58 : vector<16x16xf32>
    %c3_44 = arith.constant 3 : index
    %c0_45 = arith.constant 0 : index
    %60 = memref.load %arg3[%c3_44, %c0_45] : memref<16x4xf32, #tpu.memory_space<smem>>
    %61 = vector.broadcast %60 : f32 to vector<16x16xf32>
    %62 = arith.mulf %61, %5 : vector<16x16xf32>
    %c3_46 = arith.constant 3 : index
    %63 = memref.load %arg4[%c3_46] : memref<16xf32, #tpu.memory_space<smem>>
    %64 = vector.broadcast %63 : f32 to vector<16x16xf32>
    %65 = arith.addf %62, %64 : vector<16x16xf32>
    %c2_47 = arith.constant 2 : index
    %c1_48 = arith.constant 1 : index
    %66 = memref.load %arg3[%c2_47, %c1_48] : memref<16x4xf32, #tpu.memory_space<smem>>
    %67 = vector.broadcast %66 : f32 to vector<16x16xf32>
    %68 = arith.mulf %67, %7 : vector<16x16xf32>
    %69 = arith.addf %59, %68 : vector<16x16xf32>
    %c3_49 = arith.constant 3 : index
    %c1_50 = arith.constant 1 : index
    %70 = memref.load %arg3[%c3_49, %c1_50] : memref<16x4xf32, #tpu.memory_space<smem>>
    %71 = vector.broadcast %70 : f32 to vector<16x16xf32>
    %72 = arith.mulf %71, %7 : vector<16x16xf32>
    %73 = arith.addf %65, %72 : vector<16x16xf32>
    %c2_51 = arith.constant 2 : index
    %c2_52 = arith.constant 2 : index
    %74 = memref.load %arg3[%c2_51, %c2_52] : memref<16x4xf32, #tpu.memory_space<smem>>
    %75 = vector.broadcast %74 : f32 to vector<16x16xf32>
    %76 = arith.mulf %75, %9 : vector<16x16xf32>
    %77 = arith.addf %69, %76 : vector<16x16xf32>
    %c3_53 = arith.constant 3 : index
    %c2_54 = arith.constant 2 : index
    %78 = memref.load %arg3[%c3_53, %c2_54] : memref<16x4xf32, #tpu.memory_space<smem>>
    %79 = vector.broadcast %78 : f32 to vector<16x16xf32>
    %80 = arith.mulf %79, %9 : vector<16x16xf32>
    %81 = arith.addf %73, %80 : vector<16x16xf32>
    %c2_55 = arith.constant 2 : index
    %c3_56 = arith.constant 3 : index
    %82 = memref.load %arg3[%c2_55, %c3_56] : memref<16x4xf32, #tpu.memory_space<smem>>
    %83 = vector.broadcast %82 : f32 to vector<16x16xf32>
    %84 = arith.mulf %83, %11 : vector<16x16xf32>
    %85 = arith.addf %77, %84 : vector<16x16xf32>
    %c3_57 = arith.constant 3 : index
    %c3_58 = arith.constant 3 : index
    %86 = memref.load %arg3[%c3_57, %c3_58] : memref<16x4xf32, #tpu.memory_space<smem>>
    %87 = vector.broadcast %86 : f32 to vector<16x16xf32>
    %88 = arith.mulf %87, %11 : vector<16x16xf32>
    %89 = arith.addf %81, %88 : vector<16x16xf32>
    %cst_59 = arith.constant dense<0.000000e+00> : vector<16x32xf32>
    %90 = tpu.matmul %85, %1, %cst_59 {dimension_numbers = #tpu.dot_dimension_numbers<[1], [0], [0], [1], [0, 0, 1, 1], [], []>} : vector<16x16xf32>, vector<16x32xf32>, vector<16x32xf32> -> vector<16x32xf32>
    %cst_60 = arith.constant dense<0.000000e+00> : vector<16x32xf32>
    %91 = tpu.matmul %89, %3, %cst_60 {dimension_numbers = #tpu.dot_dimension_numbers<[1], [0], [0], [1], [0, 0, 1, 1], [], []>} : vector<16x16xf32>, vector<16x32xf32>, vector<16x32xf32> -> vector<16x32xf32>
    %92 = arith.addf %90, %91 : vector<16x32xf32>
    %c0_61 = arith.constant 0 : index
    %c0_62 = arith.constant 0 : index
    %c0_63 = arith.constant 0 : index
    %c32 = arith.constant 32 : index
    %93 = vector.load %arg6[%c0_61, %c0_62, %c0_63, %c32] : memref<1x4x16x64xf32, #tpu.memory_space<vmem>>, vector<1x1x16x32xf32>
    %94 = vector.shape_cast %93 : vector<1x1x16x32xf32> to vector<16x32xf32>
    %95 = vector.shape_cast %92 : vector<16x32xf32> to vector<1x1x16x32xf32>
    tpu.vector_store %arg6[%c0_61, %c0_62, %c0_63, %c32], %95 {strides = array<i32>} : memref<1x4x16x64xf32, #tpu.memory_space<vmem>>, vector<1x1x16x32xf32>,
    %c4 = arith.constant 4 : index
    %c0_64 = arith.constant 0 : index
    %96 = memref.load %arg3[%c4, %c0_64] : memref<16x4xf32, #tpu.memory_space<smem>>
    %97 = vector.broadcast %96 : f32 to vector<16x16xf32>
    %98 = arith.mulf %97, %5 : vector<16x16xf32>
    %c4_65 = arith.constant 4 : index
    %99 = memref.load %arg4[%c4_65] : memref<16xf32, #tpu.memory_space<smem>>
    %100 = vector.broadcast %99 : f32 to vector<16x16xf32>
    %101 = arith.addf %98, %100 : vector<16x16xf32>
    %c5 = arith.constant 5 : index
    %c0_66 = arith.constant 0 : index
    %102 = memref.load %arg3[%c5, %c0_66] : memref<16x4xf32, #tpu.memory_space<smem>>
    %103 = vector.broadcast %102 : f32 to vector<16x16xf32>
    %104 = arith.mulf %103, %5 : vector<16x16xf32>
    %c5_67 = arith.constant 5 : index
    %105 = memref.load %arg4[%c5_67] : memref<16xf32, #tpu.memory_space<smem>>
    %106 = vector.broadcast %105 : f32 to vector<16x16xf32>
    %107 = arith.addf %104, %106 : vector<16x16xf32>
    %c4_68 = arith.constant 4 : index
    %c1_69 = arith.constant 1 : index
    %108 = memref.load %arg3[%c4_68, %c1_69] : memref<16x4xf32, #tpu.memory_space<smem>>
    %109 = vector.broadcast %108 : f32 to vector<16x16xf32>
    %110 = arith.mulf %109, %7 : vector<16x16xf32>
    %111 = arith.addf %101, %110 : vector<16x16xf32>
    %c5_70 = arith.constant 5 : index
    %c1_71 = arith.constant 1 : index
    %112 = memref.load %arg3[%c5_70, %c1_71] : memref<16x4xf32, #tpu.memory_space<smem>>
    %113 = vector.broadcast %112 : f32 to vector<16x16xf32>
    %114 = arith.mulf %113, %7 : vector<16x16xf32>
    %115 = arith.addf %107, %114 : vector<16x16xf32>
    %c4_72 = arith.constant 4 : index
    %c2_73 = arith.constant 2 : index
    %116 = memref.load %arg3[%c4_72, %c2_73] : memref<16x4xf32, #tpu.memory_space<smem>>
    %117 = vector.broadcast %116 : f32 to vector<16x16xf32>
    %118 = arith.mulf %117, %9 : vector<16x16xf32>
    %119 = arith.addf %111, %118 : vector<16x16xf32>
    %c5_74 = arith.constant 5 : index
    %c2_75 = arith.constant 2 : index
    %120 = memref.load %arg3[%c5_74, %c2_75] : memref<16x4xf32, #tpu.memory_space<smem>>
    %121 = vector.broadcast %120 : f32 to vector<16x16xf32>
    %122 = arith.mulf %121, %9 : vector<16x16xf32>
    %123 = arith.addf %115, %122 : vector<16x16xf32>
    %c4_76 = arith.constant 4 : index
    %c3_77 = arith.constant 3 : index
    %124 = memref.load %arg3[%c4_76, %c3_77] : memref<16x4xf32, #tpu.memory_space<smem>>
    %125 = vector.broadcast %124 : f32 to vector<16x16xf32>
    %126 = arith.mulf %125, %11 : vector<16x16xf32>
    %127 = arith.addf %119, %126 : vector<16x16xf32>
    %c5_78 = arith.constant 5 : index
    %c3_79 = arith.constant 3 : index
    %128 = memref.load %arg3[%c5_78, %c3_79] : memref<16x4xf32, #tpu.memory_space<smem>>
    %129 = vector.broadcast %128 : f32 to vector<16x16xf32>
    %130 = arith.mulf %129, %11 : vector<16x16xf32>
    %131 = arith.addf %123, %130 : vector<16x16xf32>
    %cst_80 = arith.constant dense<0.000000e+00> : vector<16x32xf32>
    %132 = tpu.matmul %127, %1, %cst_80 {dimension_numbers = #tpu.dot_dimension_numbers<[1], [0], [0], [1], [0, 0, 1, 1], [], []>} : vector<16x16xf32>, vector<16x32xf32>, vector<16x32xf32> -> vector<16x32xf32>
    %cst_81 = arith.constant dense<0.000000e+00> : vector<16x32xf32>
    %133 = tpu.matmul %131, %3, %cst_81 {dimension_numbers = #tpu.dot_dimension_numbers<[1], [0], [0], [1], [0, 0, 1, 1], [], []>} : vector<16x16xf32>, vector<16x32xf32>, vector<16x32xf32> -> vector<16x32xf32>
    %134 = arith.addf %132, %133 : vector<16x32xf32>
    %c0_82 = arith.constant 0 : index
    %c1_83 = arith.constant 1 : index
    %c0_84 = arith.constant 0 : index
    %c0_85 = arith.constant 0 : index
    %135 = vector.load %arg6[%c0_82, %c1_83, %c0_84, %c0_85] : memref<1x4x16x64xf32, #tpu.memory_space<vmem>>, vector<1x1x16x32xf32>
    %136 = vector.shape_cast %135 : vector<1x1x16x32xf32> to vector<16x32xf32>
    %137 = vector.shape_cast %134 : vector<16x32xf32> to vector<1x1x16x32xf32>
    tpu.vector_store %arg6[%c0_82, %c1_83, %c0_84, %c0_85], %137 {strides = array<i32>} : memref<1x4x16x64xf32, #tpu.memory_space<vmem>>, vector<1x1x16x32xf32>,
    %c6 = arith.constant 6 : index
    %c0_86 = arith.constant 0 : index
    %138 = memref.load %arg3[%c6, %c0_86] : memref<16x4xf32, #tpu.memory_space<smem>>
    %139 = vector.broadcast %138 : f32 to vector<16x16xf32>
    %140 = arith.mulf %139, %5 : vector<16x16xf32>
    %c6_87 = arith.constant 6 : index
    %141 = memref.load %arg4[%c6_87] : memref<16xf32, #tpu.memory_space<smem>>
    %142 = vector.broadcast %141 : f32 to vector<16x16xf32>
    %143 = arith.addf %140, %142 : vector<16x16xf32>
    %c7 = arith.constant 7 : index
    %c0_88 = arith.constant 0 : index
    %144 = memref.load %arg3[%c7, %c0_88] : memref<16x4xf32, #tpu.memory_space<smem>>
    %145 = vector.broadcast %144 : f32 to vector<16x16xf32>
    %146 = arith.mulf %145, %5 : vector<16x16xf32>
    %c7_89 = arith.constant 7 : index
    %147 = memref.load %arg4[%c7_89] : memref<16xf32, #tpu.memory_space<smem>>
    %148 = vector.broadcast %147 : f32 to vector<16x16xf32>
    %149 = arith.addf %146, %148 : vector<16x16xf32>
    %c6_90 = arith.constant 6 : index
    %c1_91 = arith.constant 1 : index
    %150 = memref.load %arg3[%c6_90, %c1_91] : memref<16x4xf32, #tpu.memory_space<smem>>
    %151 = vector.broadcast %150 : f32 to vector<16x16xf32>
    %152 = arith.mulf %151, %7 : vector<16x16xf32>
    %153 = arith.addf %143, %152 : vector<16x16xf32>
    %c7_92 = arith.constant 7 : index
    %c1_93 = arith.constant 1 : index
    %154 = memref.load %arg3[%c7_92, %c1_93] : memref<16x4xf32, #tpu.memory_space<smem>>
    %155 = vector.broadcast %154 : f32 to vector<16x16xf32>
    %156 = arith.mulf %155, %7 : vector<16x16xf32>
    %157 = arith.addf %149, %156 : vector<16x16xf32>
    %c6_94 = arith.constant 6 : index
    %c2_95 = arith.constant 2 : index
    %158 = memref.load %arg3[%c6_94, %c2_95] : memref<16x4xf32, #tpu.memory_space<smem>>
    %159 = vector.broadcast %158 : f32 to vector<16x16xf32>
    %160 = arith.mulf %159, %9 : vector<16x16xf32>
    %161 = arith.addf %153, %160 : vector<16x16xf32>
    %c7_96 = arith.constant 7 : index
    %c2_97 = arith.constant 2 : index
    %162 = memref.load %arg3[%c7_96, %c2_97] : memref<16x4xf32, #tpu.memory_space<smem>>
    %163 = vector.broadcast %162 : f32 to vector<16x16xf32>
    %164 = arith.mulf %163, %9 : vector<16x16xf32>
    %165 = arith.addf %157, %164 : vector<16x16xf32>
    %c6_98 = arith.constant 6 : index
    %c3_99 = arith.constant 3 : index
    %166 = memref.load %arg3[%c6_98, %c3_99] : memref<16x4xf32, #tpu.memory_space<smem>>
    %167 = vector.broadcast %166 : f32 to vector<16x16xf32>
    %168 = arith.mulf %167, %11 : vector<16x16xf32>
    %169 = arith.addf %161, %168 : vector<16x16xf32>
    %c7_100 = arith.constant 7 : index
    %c3_101 = arith.constant 3 : index
    %170 = memref.load %arg3[%c7_100, %c3_101] : memref<16x4xf32, #tpu.memory_space<smem>>
    %171 = vector.broadcast %170 : f32 to vector<16x16xf32>
    %172 = arith.mulf %171, %11 : vector<16x16xf32>
    %173 = arith.addf %165, %172 : vector<16x16xf32>
    %cst_102 = arith.constant dense<0.000000e+00> : vector<16x32xf32>
    %174 = tpu.matmul %169, %1, %cst_102 {dimension_numbers = #tpu.dot_dimension_numbers<[1], [0], [0], [1], [0, 0, 1, 1], [], []>} : vector<16x16xf32>, vector<16x32xf32>, vector<16x32xf32> -> vector<16x32xf32>
    %cst_103 = arith.constant dense<0.000000e+00> : vector<16x32xf32>
    %175 = tpu.matmul %173, %3, %cst_103 {dimension_numbers = #tpu.dot_dimension_numbers<[1], [0], [0], [1], [0, 0, 1, 1], [], []>} : vector<16x16xf32>, vector<16x32xf32>, vector<16x32xf32> -> vector<16x32xf32>
    %176 = arith.addf %174, %175 : vector<16x32xf32>
    %c0_104 = arith.constant 0 : index
    %c1_105 = arith.constant 1 : index
    %c0_106 = arith.constant 0 : index
    %c32_107 = arith.constant 32 : index
    %177 = vector.load %arg6[%c0_104, %c1_105, %c0_106, %c32_107] : memref<1x4x16x64xf32, #tpu.memory_space<vmem>>, vector<1x1x16x32xf32>
    %178 = vector.shape_cast %177 : vector<1x1x16x32xf32> to vector<16x32xf32>
    %179 = vector.shape_cast %176 : vector<16x32xf32> to vector<1x1x16x32xf32>
    tpu.vector_store %arg6[%c0_104, %c1_105, %c0_106, %c32_107], %179 {strides = array<i32>} : memref<1x4x16x64xf32, #tpu.memory_space<vmem>>, vector<1x1x16x32xf32>,
    %c8 = arith.constant 8 : index
    %c0_108 = arith.constant 0 : index
    %180 = memref.load %arg3[%c8, %c0_108] : memref<16x4xf32, #tpu.memory_space<smem>>
    %181 = vector.broadcast %180 : f32 to vector<16x16xf32>
    %182 = arith.mulf %181, %5 : vector<16x16xf32>
    %c8_109 = arith.constant 8 : index
    %183 = memref.load %arg4[%c8_109] : memref<16xf32, #tpu.memory_space<smem>>
    %184 = vector.broadcast %183 : f32 to vector<16x16xf32>
    %185 = arith.addf %182, %184 : vector<16x16xf32>
    %c9 = arith.constant 9 : index
    %c0_110 = arith.constant 0 : index
    %186 = memref.load %arg3[%c9, %c0_110] : memref<16x4xf32, #tpu.memory_space<smem>>
    %187 = vector.broadcast %186 : f32 to vector<16x16xf32>
    %188 = arith.mulf %187, %5 : vector<16x16xf32>
    %c9_111 = arith.constant 9 : index
    %189 = memref.load %arg4[%c9_111] : memref<16xf32, #tpu.memory_space<smem>>
    %190 = vector.broadcast %189 : f32 to vector<16x16xf32>
    %191 = arith.addf %188, %190 : vector<16x16xf32>
    %c8_112 = arith.constant 8 : index
    %c1_113 = arith.constant 1 : index
    %192 = memref.load %arg3[%c8_112, %c1_113] : memref<16x4xf32, #tpu.memory_space<smem>>
    %193 = vector.broadcast %192 : f32 to vector<16x16xf32>
    %194 = arith.mulf %193, %7 : vector<16x16xf32>
    %195 = arith.addf %185, %194 : vector<16x16xf32>
    %c9_114 = arith.constant 9 : index
    %c1_115 = arith.constant 1 : index
    %196 = memref.load %arg3[%c9_114, %c1_115] : memref<16x4xf32, #tpu.memory_space<smem>>
    %197 = vector.broadcast %196 : f32 to vector<16x16xf32>
    %198 = arith.mulf %197, %7 : vector<16x16xf32>
    %199 = arith.addf %191, %198 : vector<16x16xf32>
    %c8_116 = arith.constant 8 : index
    %c2_117 = arith.constant 2 : index
    %200 = memref.load %arg3[%c8_116, %c2_117] : memref<16x4xf32, #tpu.memory_space<smem>>
    %201 = vector.broadcast %200 : f32 to vector<16x16xf32>
    %202 = arith.mulf %201, %9 : vector<16x16xf32>
    %203 = arith.addf %195, %202 : vector<16x16xf32>
    %c9_118 = arith.constant 9 : index
    %c2_119 = arith.constant 2 : index
    %204 = memref.load %arg3[%c9_118, %c2_119] : memref<16x4xf32, #tpu.memory_space<smem>>
    %205 = vector.broadcast %204 : f32 to vector<16x16xf32>
    %206 = arith.mulf %205, %9 : vector<16x16xf32>
    %207 = arith.addf %199, %206 : vector<16x16xf32>
    %c8_120 = arith.constant 8 : index
    %c3_121 = arith.constant 3 : index
    %208 = memref.load %arg3[%c8_120, %c3_121] : memref<16x4xf32, #tpu.memory_space<smem>>
    %209 = vector.broadcast %208 : f32 to vector<16x16xf32>
    %210 = arith.mulf %209, %11 : vector<16x16xf32>
    %211 = arith.addf %203, %210 : vector<16x16xf32>
    %c9_122 = arith.constant 9 : index
    %c3_123 = arith.constant 3 : index
    %212 = memref.load %arg3[%c9_122, %c3_123] : memref<16x4xf32, #tpu.memory_space<smem>>
    %213 = vector.broadcast %212 : f32 to vector<16x16xf32>
    %214 = arith.mulf %213, %11 : vector<16x16xf32>
    %215 = arith.addf %207, %214 : vector<16x16xf32>
    %cst_124 = arith.constant dense<0.000000e+00> : vector<16x32xf32>
    %216 = tpu.matmul %211, %1, %cst_124 {dimension_numbers = #tpu.dot_dimension_numbers<[1], [0], [0], [1], [0, 0, 1, 1], [], []>} : vector<16x16xf32>, vector<16x32xf32>, vector<16x32xf32> -> vector<16x32xf32>
    %cst_125 = arith.constant dense<0.000000e+00> : vector<16x32xf32>
    %217 = tpu.matmul %215, %3, %cst_125 {dimension_numbers = #tpu.dot_dimension_numbers<[1], [0], [0], [1], [0, 0, 1, 1], [], []>} : vector<16x16xf32>, vector<16x32xf32>, vector<16x32xf32> -> vector<16x32xf32>
    %218 = arith.addf %216, %217 : vector<16x32xf32>
    %c0_126 = arith.constant 0 : index
    %c2_127 = arith.constant 2 : index
    %c0_128 = arith.constant 0 : index
    %c0_129 = arith.constant 0 : index
    %219 = vector.load %arg6[%c0_126, %c2_127, %c0_128, %c0_129] : memref<1x4x16x64xf32, #tpu.memory_space<vmem>>, vector<1x1x16x32xf32>
    %220 = vector.shape_cast %219 : vector<1x1x16x32xf32> to vector<16x32xf32>
    %221 = vector.shape_cast %218 : vector<16x32xf32> to vector<1x1x16x32xf32>
    tpu.vector_store %arg6[%c0_126, %c2_127, %c0_128, %c0_129], %221 {strides = array<i32>} : memref<1x4x16x64xf32, #tpu.memory_space<vmem>>, vector<1x1x16x32xf32>,
    %c10 = arith.constant 10 : index
    %c0_130 = arith.constant 0 : index
    %222 = memref.load %arg3[%c10, %c0_130] : memref<16x4xf32, #tpu.memory_space<smem>>
    %223 = vector.broadcast %222 : f32 to vector<16x16xf32>
    %224 = arith.mulf %223, %5 : vector<16x16xf32>
    %c10_131 = arith.constant 10 : index
    %225 = memref.load %arg4[%c10_131] : memref<16xf32, #tpu.memory_space<smem>>
    %226 = vector.broadcast %225 : f32 to vector<16x16xf32>
    %227 = arith.addf %224, %226 : vector<16x16xf32>
    %c11 = arith.constant 11 : index
    %c0_132 = arith.constant 0 : index
    %228 = memref.load %arg3[%c11, %c0_132] : memref<16x4xf32, #tpu.memory_space<smem>>
    %229 = vector.broadcast %228 : f32 to vector<16x16xf32>
    %230 = arith.mulf %229, %5 : vector<16x16xf32>
    %c11_133 = arith.constant 11 : index
    %231 = memref.load %arg4[%c11_133] : memref<16xf32, #tpu.memory_space<smem>>
    %232 = vector.broadcast %231 : f32 to vector<16x16xf32>
    %233 = arith.addf %230, %232 : vector<16x16xf32>
    %c10_134 = arith.constant 10 : index
    %c1_135 = arith.constant 1 : index
    %234 = memref.load %arg3[%c10_134, %c1_135] : memref<16x4xf32, #tpu.memory_space<smem>>
    %235 = vector.broadcast %234 : f32 to vector<16x16xf32>
    %236 = arith.mulf %235, %7 : vector<16x16xf32>
    %237 = arith.addf %227, %236 : vector<16x16xf32>
    %c11_136 = arith.constant 11 : index
    %c1_137 = arith.constant 1 : index
    %238 = memref.load %arg3[%c11_136, %c1_137] : memref<16x4xf32, #tpu.memory_space<smem>>
    %239 = vector.broadcast %238 : f32 to vector<16x16xf32>
    %240 = arith.mulf %239, %7 : vector<16x16xf32>
    %241 = arith.addf %233, %240 : vector<16x16xf32>
    %c10_138 = arith.constant 10 : index
    %c2_139 = arith.constant 2 : index
    %242 = memref.load %arg3[%c10_138, %c2_139] : memref<16x4xf32, #tpu.memory_space<smem>>
    %243 = vector.broadcast %242 : f32 to vector<16x16xf32>
    %244 = arith.mulf %243, %9 : vector<16x16xf32>
    %245 = arith.addf %237, %244 : vector<16x16xf32>
    %c11_140 = arith.constant 11 : index
    %c2_141 = arith.constant 2 : index
    %246 = memref.load %arg3[%c11_140, %c2_141] : memref<16x4xf32, #tpu.memory_space<smem>>
    %247 = vector.broadcast %246 : f32 to vector<16x16xf32>
    %248 = arith.mulf %247, %9 : vector<16x16xf32>
    %249 = arith.addf %241, %248 : vector<16x16xf32>
    %c10_142 = arith.constant 10 : index
    %c3_143 = arith.constant 3 : index
    %250 = memref.load %arg3[%c10_142, %c3_143] : memref<16x4xf32, #tpu.memory_space<smem>>
    %251 = vector.broadcast %250 : f32 to vector<16x16xf32>
    %252 = arith.mulf %251, %11 : vector<16x16xf32>
    %253 = arith.addf %245, %252 : vector<16x16xf32>
    %c11_144 = arith.constant 11 : index
    %c3_145 = arith.constant 3 : index
    %254 = memref.load %arg3[%c11_144, %c3_145] : memref<16x4xf32, #tpu.memory_space<smem>>
    %255 = vector.broadcast %254 : f32 to vector<16x16xf32>
    %256 = arith.mulf %255, %11 : vector<16x16xf32>
    %257 = arith.addf %249, %256 : vector<16x16xf32>
    %cst_146 = arith.constant dense<0.000000e+00> : vector<16x32xf32>
    %258 = tpu.matmul %253, %1, %cst_146 {dimension_numbers = #tpu.dot_dimension_numbers<[1], [0], [0], [1], [0, 0, 1, 1], [], []>} : vector<16x16xf32>, vector<16x32xf32>, vector<16x32xf32> -> vector<16x32xf32>
    %cst_147 = arith.constant dense<0.000000e+00> : vector<16x32xf32>
    %259 = tpu.matmul %257, %3, %cst_147 {dimension_numbers = #tpu.dot_dimension_numbers<[1], [0], [0], [1], [0, 0, 1, 1], [], []>} : vector<16x16xf32>, vector<16x32xf32>, vector<16x32xf32> -> vector<16x32xf32>
    %260 = arith.addf %258, %259 : vector<16x32xf32>
    %c0_148 = arith.constant 0 : index
    %c2_149 = arith.constant 2 : index
    %c0_150 = arith.constant 0 : index
    %c32_151 = arith.constant 32 : index
    %261 = vector.load %arg6[%c0_148, %c2_149, %c0_150, %c32_151] : memref<1x4x16x64xf32, #tpu.memory_space<vmem>>, vector<1x1x16x32xf32>
    %262 = vector.shape_cast %261 : vector<1x1x16x32xf32> to vector<16x32xf32>
    %263 = vector.shape_cast %260 : vector<16x32xf32> to vector<1x1x16x32xf32>
    tpu.vector_store %arg6[%c0_148, %c2_149, %c0_150, %c32_151], %263 {strides = array<i32>} : memref<1x4x16x64xf32, #tpu.memory_space<vmem>>, vector<1x1x16x32xf32>,
    %c12 = arith.constant 12 : index
    %c0_152 = arith.constant 0 : index
    %264 = memref.load %arg3[%c12, %c0_152] : memref<16x4xf32, #tpu.memory_space<smem>>
    %265 = vector.broadcast %264 : f32 to vector<16x16xf32>
    %266 = arith.mulf %265, %5 : vector<16x16xf32>
    %c12_153 = arith.constant 12 : index
    %267 = memref.load %arg4[%c12_153] : memref<16xf32, #tpu.memory_space<smem>>
    %268 = vector.broadcast %267 : f32 to vector<16x16xf32>
    %269 = arith.addf %266, %268 : vector<16x16xf32>
    %c13 = arith.constant 13 : index
    %c0_154 = arith.constant 0 : index
    %270 = memref.load %arg3[%c13, %c0_154] : memref<16x4xf32, #tpu.memory_space<smem>>
    %271 = vector.broadcast %270 : f32 to vector<16x16xf32>
    %272 = arith.mulf %271, %5 : vector<16x16xf32>
    %c13_155 = arith.constant 13 : index
    %273 = memref.load %arg4[%c13_155] : memref<16xf32, #tpu.memory_space<smem>>
    %274 = vector.broadcast %273 : f32 to vector<16x16xf32>
    %275 = arith.addf %272, %274 : vector<16x16xf32>
    %c12_156 = arith.constant 12 : index
    %c1_157 = arith.constant 1 : index
    %276 = memref.load %arg3[%c12_156, %c1_157] : memref<16x4xf32, #tpu.memory_space<smem>>
    %277 = vector.broadcast %276 : f32 to vector<16x16xf32>
    %278 = arith.mulf %277, %7 : vector<16x16xf32>
    %279 = arith.addf %269, %278 : vector<16x16xf32>
    %c13_158 = arith.constant 13 : index
    %c1_159 = arith.constant 1 : index
    %280 = memref.load %arg3[%c13_158, %c1_159] : memref<16x4xf32, #tpu.memory_space<smem>>
    %281 = vector.broadcast %280 : f32 to vector<16x16xf32>
    %282 = arith.mulf %281, %7 : vector<16x16xf32>
    %283 = arith.addf %275, %282 : vector<16x16xf32>
    %c12_160 = arith.constant 12 : index
    %c2_161 = arith.constant 2 : index
    %284 = memref.load %arg3[%c12_160, %c2_161] : memref<16x4xf32, #tpu.memory_space<smem>>
    %285 = vector.broadcast %284 : f32 to vector<16x16xf32>
    %286 = arith.mulf %285, %9 : vector<16x16xf32>
    %287 = arith.addf %279, %286 : vector<16x16xf32>
    %c13_162 = arith.constant 13 : index
    %c2_163 = arith.constant 2 : index
    %288 = memref.load %arg3[%c13_162, %c2_163] : memref<16x4xf32, #tpu.memory_space<smem>>
    %289 = vector.broadcast %288 : f32 to vector<16x16xf32>
    %290 = arith.mulf %289, %9 : vector<16x16xf32>
    %291 = arith.addf %283, %290 : vector<16x16xf32>
    %c12_164 = arith.constant 12 : index
    %c3_165 = arith.constant 3 : index
    %292 = memref.load %arg3[%c12_164, %c3_165] : memref<16x4xf32, #tpu.memory_space<smem>>
    %293 = vector.broadcast %292 : f32 to vector<16x16xf32>
    %294 = arith.mulf %293, %11 : vector<16x16xf32>
    %295 = arith.addf %287, %294 : vector<16x16xf32>
    %c13_166 = arith.constant 13 : index
    %c3_167 = arith.constant 3 : index
    %296 = memref.load %arg3[%c13_166, %c3_167] : memref<16x4xf32, #tpu.memory_space<smem>>
    %297 = vector.broadcast %296 : f32 to vector<16x16xf32>
    %298 = arith.mulf %297, %11 : vector<16x16xf32>
    %299 = arith.addf %291, %298 : vector<16x16xf32>
    %cst_168 = arith.constant dense<0.000000e+00> : vector<16x32xf32>
    %300 = tpu.matmul %295, %1, %cst_168 {dimension_numbers = #tpu.dot_dimension_numbers<[1], [0], [0], [1], [0, 0, 1, 1], [], []>} : vector<16x16xf32>, vector<16x32xf32>, vector<16x32xf32> -> vector<16x32xf32>
    %cst_169 = arith.constant dense<0.000000e+00> : vector<16x32xf32>
    %301 = tpu.matmul %299, %3, %cst_169 {dimension_numbers = #tpu.dot_dimension_numbers<[1], [0], [0], [1], [0, 0, 1, 1], [], []>} : vector<16x16xf32>, vector<16x32xf32>, vector<16x32xf32> -> vector<16x32xf32>
    %302 = arith.addf %300, %301 : vector<16x32xf32>
    %c0_170 = arith.constant 0 : index
    %c3_171 = arith.constant 3 : index
    %c0_172 = arith.constant 0 : index
    %c0_173 = arith.constant 0 : index
    %303 = vector.load %arg6[%c0_170, %c3_171, %c0_172, %c0_173] : memref<1x4x16x64xf32, #tpu.memory_space<vmem>>, vector<1x1x16x32xf32>
    %304 = vector.shape_cast %303 : vector<1x1x16x32xf32> to vector<16x32xf32>
    %305 = vector.shape_cast %302 : vector<16x32xf32> to vector<1x1x16x32xf32>
    tpu.vector_store %arg6[%c0_170, %c3_171, %c0_172, %c0_173], %305 {strides = array<i32>} : memref<1x4x16x64xf32, #tpu.memory_space<vmem>>, vector<1x1x16x32xf32>,
    %c14 = arith.constant 14 : index
    %c0_174 = arith.constant 0 : index
    %306 = memref.load %arg3[%c14, %c0_174] : memref<16x4xf32, #tpu.memory_space<smem>>
    %307 = vector.broadcast %306 : f32 to vector<16x16xf32>
    %308 = arith.mulf %307, %5 : vector<16x16xf32>
    %c14_175 = arith.constant 14 : index
    %309 = memref.load %arg4[%c14_175] : memref<16xf32, #tpu.memory_space<smem>>
    %310 = vector.broadcast %309 : f32 to vector<16x16xf32>
    %311 = arith.addf %308, %310 : vector<16x16xf32>
    %c15 = arith.constant 15 : index
    %c0_176 = arith.constant 0 : index
    %312 = memref.load %arg3[%c15, %c0_176] : memref<16x4xf32, #tpu.memory_space<smem>>
    %313 = vector.broadcast %312 : f32 to vector<16x16xf32>
    %314 = arith.mulf %313, %5 : vector<16x16xf32>
    %c15_177 = arith.constant 15 : index
    %315 = memref.load %arg4[%c15_177] : memref<16xf32, #tpu.memory_space<smem>>
    %316 = vector.broadcast %315 : f32 to vector<16x16xf32>
    %317 = arith.addf %314, %316 : vector<16x16xf32>
    %c14_178 = arith.constant 14 : index
    %c1_179 = arith.constant 1 : index
    %318 = memref.load %arg3[%c14_178, %c1_179] : memref<16x4xf32, #tpu.memory_space<smem>>
    %319 = vector.broadcast %318 : f32 to vector<16x16xf32>
    %320 = arith.mulf %319, %7 : vector<16x16xf32>
    %321 = arith.addf %311, %320 : vector<16x16xf32>
    %c15_180 = arith.constant 15 : index
    %c1_181 = arith.constant 1 : index
    %322 = memref.load %arg3[%c15_180, %c1_181] : memref<16x4xf32, #tpu.memory_space<smem>>
    %323 = vector.broadcast %322 : f32 to vector<16x16xf32>
    %324 = arith.mulf %323, %7 : vector<16x16xf32>
    %325 = arith.addf %317, %324 : vector<16x16xf32>
    %c14_182 = arith.constant 14 : index
    %c2_183 = arith.constant 2 : index
    %326 = memref.load %arg3[%c14_182, %c2_183] : memref<16x4xf32, #tpu.memory_space<smem>>
    %327 = vector.broadcast %326 : f32 to vector<16x16xf32>
    %328 = arith.mulf %327, %9 : vector<16x16xf32>
    %329 = arith.addf %321, %328 : vector<16x16xf32>
    %c15_184 = arith.constant 15 : index
    %c2_185 = arith.constant 2 : index
    %330 = memref.load %arg3[%c15_184, %c2_185] : memref<16x4xf32, #tpu.memory_space<smem>>
    %331 = vector.broadcast %330 : f32 to vector<16x16xf32>
    %332 = arith.mulf %331, %9 : vector<16x16xf32>
    %333 = arith.addf %325, %332 : vector<16x16xf32>
    %c14_186 = arith.constant 14 : index
    %c3_187 = arith.constant 3 : index
    %334 = memref.load %arg3[%c14_186, %c3_187] : memref<16x4xf32, #tpu.memory_space<smem>>
    %335 = vector.broadcast %334 : f32 to vector<16x16xf32>
    %336 = arith.mulf %335, %11 : vector<16x16xf32>
    %337 = arith.addf %329, %336 : vector<16x16xf32>
    %c15_188 = arith.constant 15 : index
    %c3_189 = arith.constant 3 : index
    %338 = memref.load %arg3[%c15_188, %c3_189] : memref<16x4xf32, #tpu.memory_space<smem>>
    %339 = vector.broadcast %338 : f32 to vector<16x16xf32>
    %340 = arith.mulf %339, %11 : vector<16x16xf32>
    %341 = arith.addf %333, %340 : vector<16x16xf32>
    %cst_190 = arith.constant dense<0.000000e+00> : vector<16x32xf32>
    %342 = tpu.matmul %337, %1, %cst_190 {dimension_numbers = #tpu.dot_dimension_numbers<[1], [0], [0], [1], [0, 0, 1, 1], [], []>} : vector<16x16xf32>, vector<16x32xf32>, vector<16x32xf32> -> vector<16x32xf32>
    %cst_191 = arith.constant dense<0.000000e+00> : vector<16x32xf32>
    %343 = tpu.matmul %341, %3, %cst_191 {dimension_numbers = #tpu.dot_dimension_numbers<[1], [0], [0], [1], [0, 0, 1, 1], [], []>} : vector<16x16xf32>, vector<16x32xf32>, vector<16x32xf32> -> vector<16x32xf32>
    %344 = arith.addf %342, %343 : vector<16x32xf32>
    %c0_192 = arith.constant 0 : index
    %c3_193 = arith.constant 3 : index
    %c0_194 = arith.constant 0 : index
    %c32_195 = arith.constant 32 : index
    %345 = vector.load %arg6[%c0_192, %c3_193, %c0_194, %c32_195] : memref<1x4x16x64xf32, #tpu.memory_space<vmem>>, vector<1x1x16x32xf32>
    %346 = vector.shape_cast %345 : vector<1x1x16x32xf32> to vector<16x32xf32>
    %347 = vector.shape_cast %344 : vector<16x32xf32> to vector<1x1x16x32xf32>
    tpu.vector_store %arg6[%c0_192, %c3_193, %c0_194, %c32_195], %347 {strides = array<i32>} : memref<1x4x16x64xf32, #tpu.memory_space<vmem>>, vector<1x1x16x32xf32>,
    return
  }
  func.func @transform_0(%arg0: i32, %arg1: i32) -> (i32, i32, i32, i32) {
    %c0_i32 = arith.constant 0 : i32
    %c0_i32_0 = arith.constant 0 : i32
    %c0_i32_1 = arith.constant 0 : i32
    return %arg0, %c0_i32, %arg1, %c0_i32_0 : i32, i32, i32, i32
  }
  func.func @transform_1(%arg0: i32, %arg1: i32) -> (i32, i32) {
    %c0_i32 = arith.constant 0 : i32
    %c0_i32_0 = arith.constant 0 : i32
    %c0_i32_1 = arith.constant 0 : i32
    return %c0_i32, %c0_i32_0 : i32, i32
  }
  func.func @transform_2(%arg0: i32, %arg1: i32) -> i32 {
    %c0_i32 = arith.constant 0 : i32
    %c0_i32_0 = arith.constant 0 : i32
    return %c0_i32 : i32
  }
  func.func @transform_3(%arg0: i32, %arg1: i32) -> (i32, i32, i32) {
    %c0_i32 = arith.constant 0 : i32
    %c0_i32_0 = arith.constant 0 : i32
    %c0_i32_1 = arith.constant 0 : i32
    %c0_i32_2 = arith.constant 0 : i32
    return %c0_i32, %c0_i32_0, %c0_i32_1 : i32, i32, i32
  }
  func.func @transform_4(%arg0: i32, %arg1: i32) -> (i32, i32, i32, i32) {
    %c0_i32 = arith.constant 0 : i32
    %c0_i32_0 = arith.constant 0 : i32
    %c0_i32_1 = arith.constant 0 : i32
    return %arg0, %c0_i32, %arg1, %c0_i32_0 : i32, i32, i32, i32
  }
}

</mosaic_0001>

<bundles_post_ra>
// kernel: upsample_forward.1
= control target key start
LH: loop header
LB: loop body
LE: loop exit
PB: predicated region body
PF: predicated region fallthrough
CT: control target
= control target key end

     0   :  { %9 = vsyncpa [#allocation3], 0  ;;  %s2397_s0 = inlined_call_operand.hbm [shape: f32[2,4,16,16], index: 0, kind: input, shape index: {}]   ;;  %s2398_s1 = inlined_call_operand.vmem [shape: f32[16,4], index: 1, kind: input, shape index: {}]   ;;  %s2399_s2 = inlined_call_operand.vmem [shape: f32[16], index: 2, kind: input, shape index: {}]   ;;  %s2400_s3 = inlined_call_operand.vmem [shape: f32[2,16,32], index: 3, kind: input, shape index: {}]   ;;  %s2401_s4 = inlined_call_operand.vmem [shape: f32[2,4,16,64], index: 4, kind: output, shape index: {}]  }
   0x1   :  { %11 = vsyncpa [#allocation3 + $0x1], 0 }
   0x2   :  { %12 = vsyncpa [#allocation4], 0 }
   0x3   :  { %13 = vsyncpa [#allocation7], 0  ;;  %s1722_s15 = smov 0   ;;  %s1724_s16 = smov 0  }
   0x4   :  { %s1726_s17 = smov 0   ;;  %s1728_s18 = smov 0  }
   0x5   :  { %s1730_s19 = smov 0   ;;  %s1732_s20 = smov 0  }
   0x6 LB: > { %s1344_s21 = sadd.s32 4294967295, %s1690_s20   ;;  %p53_p0 = scmp.ne.s32.totalorder %s1674_s16, %s1670_s15  ;;  %s1690_s20 = sphi %s1732_s20, %s19_s20   ;;  %s1686_s19 = sphi %s1730_s19, %s2410_s19   ;;  %s1682_s18 = sphi %s1728_s18, %s2409_s18   ;;  %s1678_s17 = sphi %s1726_s17, %s2408_s17   ;;  %s1674_s16 = sphi %s1724_s16, %s2407_s16   ;;  %s1670_s15 = sphi %s1722_s15, %s2406_s15  }
   0x7   : > { %p1752_p1 = scmp.eq.s32.totalorder %s1344_s21, 0  ;;  %p1346_p2 = scmp.ge.s32.totalorder %s1690_s20, 1 }
   0x8   : > { %p155_p3 = scmp.lt.s32.totalorder %s1690_s20, 3  ;;  %s166_s26 = sshll.u32 %s2398_s1, 4  ;;  %s167_s26 = int_to_ptr.vmem [resolvable:$true] %s166_s26 }
   0x9   : > { %p1760_p4 = por %p1752_p1, %p53_p0  ;;  %s179_s30 = sshll.u32 %s2399_s2, 4  ;;  %s180_s30 = int_to_ptr.vmem [resolvable:$true] %s179_s30 }
   0xa   : > { %p1767_p5 = pnand %p1346_p2, %p155_p3  ;;  %s1692_s5 = smov [#allocation5]  }
   0xb   : > { %s1693_s6 = smov 128   ;;  %s1694_s7 = smov 8  }
   0xc   : > { %p1503_p6 = pneg %p1767_p5  ;;  %s1695_s8 = smov [#allocation6]  }
   0xd   : > { %s31_s9 = sadd.s32 1, %s1686_s19  ;;  %s40_s10 = sadd.s32 1, %s1678_s17 }
   0xe   : > { %p1504_p7 = pnand %p1503_p6, %p1752_p1  ;;  %p33_p8 = scmp.ge.s32.totalorder %s31_s9, 2 }
   0xf   : > { %p47_p9 = scmp.ne.s32.totalorder %s1678_s17, %s1674_s16  ;;  %p48_p10 = scmp.eq.s32.totalorder %s1690_s20, 0 }
  0x10   : > { %1506 = dma.vmem_to_smem (!%p1504_p7), %s167_s26, 256, %s1692_s5, [#allocation4], %s1693_s6, %s1693_s6, %s1694_s7  }
  0x11   : > { %1509 = dma.vmem_to_smem (!%p1504_p7), %s180_s30, 16, %s1695_s8, [#allocation7]  }
  0x12   : > { %p1516_p11 = scmp.lt.s32.totalorder %s1690_s20, 2  ;;  %s2412_s9 = smov (%p33_p8, %s31_s9), 0 }
  0x13   : > { %p1789_p12 = por %p48_p10, %p47_p9  ;;  %s193_s12 = sand.u32 1, %s1678_s17  }
  0x14   : > { %s35_s13 = ssub.s32 %s1686_s19, %s2412_s9  ;;  %s1350_s14 = sshll.u32 %s193_s12, 6 }
  0x15   : > { %p38_p13 = scmp.eq.s32.totalorder %s35_s13, 0  ;;  %s1491_s15 = sshll.u32 %s1686_s19, 6 }
  0x16   : > { %s204_s26 = scalar_lea.hbm %s2397_s0, %s1491_s15  ;;  %s197_s28 = scalar_lea.vmem [#allocation2], %s1350_s14 }
  0x17   : > { %s1798_s21 = scalar_select %p38_p13, %s1678_s17, %s40_s10  }
  0x18   : > { %s207_s29 = sshll.u32 %s197_s28, 4  ;;  %s205_s30 = sshll.u32 %s204_s26, 4  ;;  %s208_s29 = int_to_ptr.vmem [resolvable:$true] %s207_s29  ;;  %s206_s30 = int_to_ptr.hbm [resolvable:$true] %s205_s30 }
  0x19   : > { %p1511_p0 = pnand %p1516_p11, %p1789_p12  ;;  %s194_s5 = scalar_lea.sflag [#allocation3], %s193_s12 }
  0x1a   : > { %219 = sbr.rel (%p1767_p5) target bundleno = 366 (0x16e), region = 36  ;;  %s221_s8 = sand.u32 (!%p1767_p5), 1, %s1674_s16  }
  0x1b   : > { %1513 = dma.hbm_to_vmem [thread:$0]  (!%p1511_p0), %s206_s30, 1024, %s208_s29, %s194_s5, %s1693_s6, %s1693_s6, %s1694_s7  }
  0x1c   : > { %s1354_s10 = sshll.u32 (!%p1767_p5), %s221_s8, 6  ;;  %s222_s13 = scalar_lea.sflag (!%p1767_p5), [#allocation3], %s221_s8 }
  0x1d   : > { %s1813_s14 = scalar_lea.vmem (!%p1767_p5), [#allocation2], %s1354_s10 }
  0x1f   : > { %1657 = dma.done.wait (%p1760_p4), %s222_s13, 1024  }
  0x20   : > { %1659 = vsyncadd (%p1760_p4), %s222_s13, 4294966272 }
  0x21   : > { %1661 = dma.done.wait (%p1752_p1), [#allocation4], 256  }
  0x22   : > { %1663 = vsyncadd (%p1752_p1), [#allocation4], 4294967040 }
  0x23   : > { %1665 = dma.done.wait (%p1752_p1), [#allocation7], 16  }
  0x24   : > { %1667 = vsyncadd (%p1752_p1), [#allocation7], 4294967280 }
  0x25   : > { %241 = sfence }
  0x26   : > { %v1830_v0 = vld [vmem:[%s2400_s3 + $0x18] sm:$0xff]  ;;  %v1835_v1 = vld [vmem:[%s2400_s3 + $0x8] sm:$0xff]  ;;  %v1840_v2 = vld [vmem:[%s2400_s3 + $0x10] sm:$0xff]  ;;  %s1381_s22 = sld [smem:[#allocation5 + $0x180]]  ;;  %vm345_vm0 = vcmask 130048   ;;  %p268_p1 = scmp.lt.s32.totalorder %s1682_s18, 1 }
  0x27   : > { %479 = vmatpush.msra.mxu2 %v1830_v0  ;;  %508 = vmatpush.msra.mxu3 %v1835_v1  ;;  %v1847_v3 = vld [vmem:[%s2400_s3] sm:$0xff]  ;;  %s1849_s25 = sld [smem:[#allocation6 + $0x3]]  ;;  %v1867_v5 = vld [vmem:[%s1813_s14 + $0x8] sm:$0xff]  ;;  %v1874_v6 = vld [vmem:[%s1813_s14 + $0x10] sm:$0xff]  ;;  %vm404_vm1 = vcmask 261120   ;;  %vm525_vm2 = vcmask 523520  }
  0x28   : > { %s1851_s26 = sld [smem:[#allocation5 + $0x181]]  ;;  %366 = vmatpush.msra.mxu0 %v1830_v0  ;;  %395 = vmatpush.msra.mxu1 %v1835_v1  ;;  %v1860_v4 = vld [vmem:[%s1813_s14] sm:$0xff]  ;;  %v1888_v11 = vld [vmem:[%s1813_s14 + $0x18] sm:$0xff]  ;;  %v1894_v13 = vld [vmem:[%s1813_s14 + $0x30] sm:$0xff]  ;;  %s2414_s18 = smov (!%p268_p1, %s1682_s18), 1 }
  0x29   : > { %480 = vmatpush.msra.mxu2 %v1840_v2  ;;  %509 = vmatpush.msra.mxu3 %v1847_v3  ;;  %s1857_s28 = sld [smem:[#allocation5 + $0x182]]  ;;  %v1881_v8 = vld [vmem:[%s1813_s14 + $0x20] sm:$0xff]  ;;  %v1900_v15 = vld [vmem:[%s1813_s14 + $0x28] sm:$0xff]  ;;  %v1916_v26 = vld [vmem:[%s1813_s14 + $0x38] sm:$0xff] }
  0x2a   : > { %s1862_s29 = sld [smem:[#allocation5 + $0x183]]  ;;  %367 = vmatpush.msra.mxu0 %v1840_v2  ;;  %396 = vmatpush.msra.mxu1 %v1847_v3 }
  0x2b   : > { %713 = vmatpush.msrb.mxu2 %v1830_v0  ;;  %742 = vmatpush.msrb.mxu3 %v1835_v1  ;;  %s1869_s30 = sld [smem:[#allocation5 + $0x100]] }
  0x2c   : > { %v416_v7 = vstv %s1381_s22  ;;  %s1876_s5 = sld [smem:[#allocation6 + $0x2]]  ;;  %600 = vmatpush.msrb.mxu0 %v1830_v0  ;;  %629 = vmatpush.msrb.mxu1 %v1835_v1 }
  0x2d   : > { %714 = vmatpush.msrb.mxu2 %v1840_v2  ;;  %743 = vmatpush.msrb.mxu3 %v1847_v3  ;;  %v417_v9 = vmul.f32 %v416_v7, %v1860_v4  ;;  %v420_v10 = vstv %s1849_s25  ;;  %s1885_s8 = sld [smem:[#allocation5 + $0x101]]  ;;  %v418_v12 = vmul.f32 %v416_v7, %v1867_v5 }
  0x2e   : > { %v430_v14 = vstv %s1851_s26  ;;  %s1897_s10 = sld [smem:[#allocation5 + $0x102]]  ;;  %601 = vmatpush.msrb.mxu0 %v1840_v2  ;;  %630 = vmatpush.msrb.mxu1 %v1847_v3 }
  0x2f   : > { %v421_v16 = vadd.f32 %v420_v10, %v417_v9  ;;  %v431_v17 = vmul.f32 %v1874_v6, %v430_v14  ;;  %v442_v18 = vstv %s1857_s28  ;;  %s1904_s13 = sld [smem:[#allocation5 + $0x103]]  ;;  %v422_v19 = vadd.f32 %v420_v10, %v418_v12 }
  0x30   : > { %v443_v20 = vmul.f32 %v1881_v8, %v442_v18  ;;  %v454_v21 = vstv %s1862_s29  ;;  %v432_v22 = vmul.f32 %v1888_v11, %v430_v14  ;;  %s1911_s27 = sld [smem:[#allocation5 + $0x380]]  ;;  %v444_v27 = vmul.f32 %v1900_v15, %v442_v18 }
  0x31   : > { %v433_v23 = vadd.f32 %v431_v17, %v421_v16  ;;  %v455_v24 = vmul.f32 %v1894_v13, %v454_v21  ;;  %v408_v25 = vstv %s1869_s30  ;;  %s1919_s6 = sld [smem:[#allocation6 + $0x7]]  ;;  %v456_v37 = vmul.f32 %v1916_v26, %v454_v21 }
  0x32   : > { %v409_v28 = vmul.f32 %v408_v25, %v1860_v4  ;;  %v412_v29 = vstv %s1876_s5  ;;  %v434_v30 = vadd.f32 %v432_v22, %v422_v19  ;;  %v410_v31 = vmul.f32 %v408_v25, %v1867_v5  ;;  %s1924_s23 = sld [smem:[#allocation5 + $0x381]] }
  0x33   : > { %v445_v32 = vadd.f32 %v443_v20, %v433_v23  ;;  %v424_v33 = vstv %s1885_s8  ;;  %s1927_s7 = sld [smem:[#allocation5 + $0x382]] }
  0x34   : > { %v413_v34 = vadd.f32 %v412_v29, %v409_v28  ;;  %v425_v35 = vmul.f32 %v1874_v6, %v424_v33  ;;  %v436_v36 = vstv %s1897_s10  ;;  %s1932_s14 = sld [smem:[#allocation5 + $0x383]]  ;;  %v414_v41 = vadd.f32 %v412_v29, %v410_v31 }
  0x35   : > { %v457_v38 = vadd.f32 %v455_v24, %v445_v32  ;;  %v437_v39 = vmul.f32 %v1881_v8, %v436_v36  ;;  %v448_v40 = vstv %s1904_s13  ;;  %s1936_s11 = sld [smem:[#allocation5 + $0x300]]  ;;  %v446_v44 = vadd.f32 %v444_v27, %v434_v30 }
  0x36   : > { %v427_v42 = vadd.f32 %v425_v35, %v413_v34  ;;  %v449_v43 = vmul.f32 %v1894_v13, %v448_v40  ;;  %v426_v45 = vmul.f32 %v1888_v11, %v424_v33  ;;  %s1940_s12 = sld [smem:[#allocation6 + $0x6]]  ;;  %v438_v46 = vmul.f32 %v1900_v15, %v436_v36 }
  0x37   : > { %1389 = vmatmul.msk.f32.vlgmr.msra.gmra.mxu2 %vm345_vm0, %v457_v38  ;;  %v650_v47 = vstv %s1911_s27  ;;  %v654_v48 = vstv %s1919_s6  ;;  %s1946_s22 = sld [smem:[#allocation5 + $0x301]]  ;;  %v458_v58 = vadd.f32 %v456_v37, %v446_v44  ;;  %v450_v9 = vmul.f32 %v1916_v26, %v448_v40 }
  0x38   : > { %v439_v49 = vadd.f32 %v437_v39, %v427_v42  ;;  %v428_v50 = vadd.f32 %v426_v45, %v414_v41  ;;  %v651_v51 = vmul.f32 %v650_v47, %v1860_v4  ;;  %v664_v52 = vstv %s1924_s23  ;;  %s1950_s15 = sld [smem:[#allocation5 + $0x302]]  ;;  %946 = vmatpush.msra.mxu2 %v1830_v0 }
  0x39   : > { %v665_v53 = vmul.f32 %v1874_v6, %v664_v52  ;;  %v676_v54 = vstv %s1927_s7  ;;  %s1955_s24 = sld [smem:[#allocation5 + $0x303]]  ;;  %v652_v55 = vmul.f32 %v650_v47, %v1867_v5  ;;  %v666_v56 = vmul.f32 %v1888_v11, %v664_v52 }
  0x3a   : > { %v451_v57 = vadd.f32 %v449_v43, %v439_v49  ;;  %v655_v59 = vadd.f32 %v654_v48, %v651_v51  ;;  %947 = vmatpush.msra.mxu2 %v1840_v2  ;;  %s1960_s25 = sld [smem:[#allocation5 + $0x580]]  ;;  %v677_v60 = vmul.f32 %v1881_v8, %v676_v54  ;;  %v688_v61 = vstv %s1932_s14 }
  0x3b   : > { %v642_v62 = vstv %s1936_s11  ;;  %v656_v63 = vadd.f32 %v654_v48, %v652_v55  ;;  %s1965_s26 = sld [smem:[#allocation6 + $0xb]]  ;;  %v440_v7 = vadd.f32 %v438_v46, %v428_v50  ;;  %v678_v18 = vmul.f32 %v1900_v15, %v676_v54 }
  0x3c   : > { %1391 = vmatmul.msk.f32.vlgmr.msra.gmra.mxu3 %vm345_vm0, %v451_v57  ;;  %v667_v10 = vadd.f32 %v665_v53, %v655_v59  ;;  %v643_v12 = vmul.f32 %v642_v62, %v1860_v4  ;;  %s1970_s28 = sld [smem:[#allocation5 + $0x581]]  ;;  %v646_v14 = vstv %s1940_s12  ;;  %v689_v19 = vmul.f32 %v1894_v13, %v688_v61 }
  0x3d   : > { %v658_v16 = vstv %s1946_s22  ;;  %975 = vmatpush.msra.mxu3 %v1835_v1  ;;  %v668_v17 = vadd.f32 %v666_v56, %v656_v63  ;;  %s1976_s29 = sld [smem:[#allocation5 + $0x582]]  ;;  %v644_v27 = vmul.f32 %v642_v62, %v1867_v5  ;;  %v452_v28 = vadd.f32 %v450_v9, %v440_v7 }
  0x3e   : > { %v647_v20 = vadd.f32 %v646_v14, %v643_v12  ;;  %v659_v21 = vmul.f32 %v1874_v6, %v658_v16  ;;  %v670_v22 = vstv %s1950_s15  ;;  %s1981_s30 = sld [smem:[#allocation5 + $0x583]]  ;;  %v679_v23 = vadd.f32 %v677_v60, %v667_v10 }
  0x3f   : > { %1390 = vmatmul.msk.f32.gmra.mxu2 %vm345_vm0, %v458_v58  ;;  %v671_v24 = vmul.f32 %v1881_v8, %v670_v22  ;;  %v682_v25 = vstv %s1955_s24  ;;  %976 = vmatpush.msra.mxu3 %v1847_v3  ;;  %s1988_s5 = sld [smem:[#allocation5 + $0x500]]  ;;  %v660_v31 = vmul.f32 %v1888_v11, %v658_v16  ;;  %v680_v32 = vadd.f32 %v678_v18, %v668_v17 }
  0x40   : > { %v661_v29 = vadd.f32 %v659_v21, %v647_v20  ;;  %v683_v30 = vmul.f32 %v1894_v13, %v682_v25  ;;  %s1992_s8 = sld [smem:[#allocation6 + $0xa]]  ;;  %v690_v33 = vmul.f32 %v1916_v26, %v688_v61  ;;  %v648_v34 = vadd.f32 %v646_v14, %v644_v27 }
  0x41   : > { %v672_v35 = vmul.f32 %v1900_v15, %v670_v22  ;;  %s1996_s10 = sld [smem:[#allocation5 + $0x501]]  ;;  %v883_v37 = vstv %s1960_s25  ;;  %v887_v38 = vstv %s1965_s26  ;;  %v691_v40 = vadd.f32 %v689_v19, %v679_v23 }
  0x42   : > { %v673_v36 = vadd.f32 %v671_v24, %v661_v29  ;;  %v897_v39 = vstv %s1970_s28  ;;  %s2001_s13 = sld [smem:[#allocation5 + $0x502]]  ;;  %v662_v41 = vadd.f32 %v660_v31, %v648_v34  ;;  %v884_v42 = vmul.f32 %v883_v37, %v1860_v4 }
  0x43   : > { %v898_v43 = vmul.f32 %v1874_v6, %v897_v39  ;;  %s2005_s27 = sld [smem:[#allocation5 + $0x503]]  ;;  %v684_v45 = vmul.f32 %v1916_v26, %v682_v25  ;;  %v909_v46 = vstv %s1976_s29  ;;  %v885_v47 = vmul.f32 %v883_v37, %v1867_v5 }
  0x44   : > { %1392 = vmatmul.msk.f32.gmra.mxu3 %vm345_vm0, %v452_v28  ;;  %v685_v44 = vadd.f32 %v683_v30, %v673_v36  ;;  %s2011_s6 = sld [smem:[#allocation5 + $0x780]]  ;;  %v674_v48 = vadd.f32 %v672_v35, %v662_v41  ;;  %v888_v49 = vadd.f32 %v887_v38, %v884_v42  ;;  %v921_v50 = vstv %s1981_s30 }
  0x45   : > { %v875_v51 = vstv %s1988_s5  ;;  %s2015_s23 = sld [smem:[#allocation6 + $0xf]]  ;;  %v889_v54 = vadd.f32 %v887_v38, %v885_v47  ;;  %v899_v55 = vmul.f32 %v1888_v11, %v897_v39  ;;  %v910_v57 = vmul.f32 %v1881_v8, %v909_v46 }
  0x46   : > { %v876_v52 = vmul.f32 %v875_v51, %v1860_v4  ;;  %v879_v53 = vstv %s1992_s8  ;;  %s2020_s7 = sld [smem:[#allocation5 + $0x781]]  ;;  %v900_v56 = vadd.f32 %v898_v43, %v888_v49  ;;  %v911_v59 = vmul.f32 %v1900_v15, %v909_v46 }
  0x47   : > { %1419 = vmatmul.msk.f32.vlgmr.msrb.gmra.mxu2 %vm345_vm0, %v691_v40  ;;  %v891_v58 = vstv %s1996_s10  ;;  %s2026_s14 = sld [smem:[#allocation5 + $0x782]]  ;;  %v901_v63 = vadd.f32 %v899_v55, %v889_v54  ;;  %v692_v7 = vadd.f32 %v690_v33, %v680_v32  ;;  %v922_v9 = vmul.f32 %v1894_v13, %v921_v50 }
  0x48   : > { %v880_v60 = vadd.f32 %v879_v53, %v876_v52  ;;  %v892_v61 = vmul.f32 %v1874_v6, %v891_v58  ;;  %v903_v62 = vstv %s2001_s13  ;;  %1179 = vmatpush.msrb.mxu2 %v1830_v0  ;;  %s2031_s11 = sld [smem:[#allocation5 + $0x783]]  ;;  %v686_v12 = vadd.f32 %v684_v45, %v674_v48 }
  0x49   : > { %v915_v10 = vstv %s2005_s27  ;;  %s2035_s12 = sld [smem:[#allocation5 + $0x700]]  ;;  %v904_v16 = vmul.f32 %v1881_v8, %v903_v62  ;;  %v877_v17 = vmul.f32 %v875_v51, %v1867_v5  ;;  %v912_v18 = vadd.f32 %v910_v57, %v900_v56 }
  0x4a   : > { %v894_v14 = vadd.f32 %v892_v61, %v880_v60  ;;  %1180 = vmatpush.msrb.mxu2 %v1840_v2  ;;  %s2040_s22 = sld [smem:[#allocation6 + $0xe]]  ;;  %v916_v19 = vmul.f32 %v1894_v13, %v915_v10  ;;  %v923_v20 = vmul.f32 %v1916_v26, %v921_v50  ;;  %v893_v21 = vmul.f32 %v1888_v11, %v891_v58 }
  0x4b   : > { %s2045_s15 = sld [smem:[#allocation5 + $0x701]]  ;;  %v913_v22 = vadd.f32 %v911_v59, %v901_v63  ;;  %v881_v23 = vadd.f32 %v879_v53, %v877_v17  ;;  %v905_v24 = vmul.f32 %v1900_v15, %v903_v62  ;;  %v1116_v25 = vstv %s2011_s6 }
  0x4c   : > { %1421 = vmatmul.msk.f32.vlgmr.msrb.gmra.mxu3 %vm345_vm0, %v685_v44  ;;  %s2050_s24 = sld [smem:[#allocation5 + $0x702]]  ;;  %v1117_v27 = vmul.f32 %v1116_v25, %v1860_v4  ;;  %v1120_v28 = vstv %s2015_s23  ;;  %v1130_v29 = vstv %s2020_s7  ;;  %v906_v31 = vadd.f32 %v904_v16, %v894_v14 }
  0x4d   : > { %1208 = vmatpush.msrb.mxu3 %v1835_v1  ;;  %v1142_v30 = vstv %s2026_s14  ;;  %s2057_s25 = sld [smem:[#allocation5 + $0x703]]  ;;  %v895_v32 = vadd.f32 %v893_v21, %v881_v23  ;;  %v917_v33 = vmul.f32 %v1916_v26, %v915_v10  ;;  %v1131_v34 = vmul.f32 %v1874_v6, %v1130_v29 }
  0x4e   : > { %s2061_s26 = sld [smem:[#allocation5 + $0x80]]  ;;  %v1121_v35 = vadd.f32 %v1120_v28, %v1117_v27  ;;  %v1143_v36 = vmul.f32 %v1881_v8, %v1142_v30  ;;  %v1118_v38 = vmul.f32 %v1116_v25, %v1867_v5  ;;  %v1154_v40 = vstv %s2031_s11 }
  0x4f   : > { %1420 = vmatmul.msk.f32.gmra.mxu2 %vm345_vm0, %v692_v7  ;;  %1209 = vmatpush.msrb.mxu3 %v1847_v3  ;;  %v1108_v37 = vstv %s2035_s12  ;;  %s2068_s28 = sld [smem:[#allocation6 + $0x1]]  ;;  %v907_v39 = vadd.f32 %v905_v24, %v895_v32  ;;  %v1132_v46 = vmul.f32 %v1888_v11, %v1130_v29  ;;  %v924_v50 = vadd.f32 %v922_v9, %v912_v18 }
  0x50   : > { %v1109_v41 = vmul.f32 %v1108_v37, %v1860_v4  ;;  %v1112_v42 = vstv %s2040_s22  ;;  %s2073_s29 = sld [smem:[#allocation5 + $0x81]]  ;;  %v1133_v43 = vadd.f32 %v1131_v34, %v1121_v35  ;;  %v1122_v45 = vadd.f32 %v1120_v28, %v1118_v38 }
  0x51   : > { %v1124_v44 = vstv %s2045_s15  ;;  %s2077_s30 = sld [smem:[#allocation5 + $0x82]]  ;;  %v1155_v52 = vmul.f32 %v1894_v13, %v1154_v40  ;;  %v918_v54 = vadd.f32 %v916_v19, %v906_v31  ;;  %v925_v55 = vadd.f32 %v923_v20, %v913_v22 }
  0x52   : > { %v1113_v47 = vadd.f32 %v1112_v42, %v1109_v41  ;;  %v1125_v48 = vmul.f32 %v1874_v6, %v1124_v44  ;;  %v1136_v49 = vstv %s2050_s24  ;;  %s2083_s5 = sld [smem:[#allocation5 + $0x83]]  ;;  %v1145_v51 = vadd.f32 %v1143_v36, %v1133_v43 }
  0x53   : > { %v1148_v53 = vstv %s2057_s25  ;;  %s2087_s8 = sld [smem:[#allocation5]]  ;;  %v2092_v56 = vadd.f32 %v917_v33, %v907_v39  ;;  %v1137_v58 = vmul.f32 %v1881_v8, %v1136_v49  ;;  %v1134_v59 = vadd.f32 %v1132_v46, %v1122_v45 }
  0x54   : > { %1422 = vmatmul.msk.f32.gmra.mxu3 %vm345_vm0, %v686_v12  ;;  %s2090_s10 = sld [smem:[#allocation6]]  ;;  %v1127_v57 = vadd.f32 %v1125_v48, %v1113_v47  ;;  %v2100_v60 = vmul.f32 %v1894_v13, %v1148_v53  ;;  %v1144_v61 = vmul.f32 %v1900_v15, %v1142_v30  ;;  %v2104_v62 = vmul.f32 %v1916_v26, %v1154_v40 }
  0x55   : > { %s2095_s13 = sld [smem:[#allocation5 + $0x1]]  ;;  %v302_v63 = vstv %s2061_s26  ;;  %v2110_v7 = vadd.f32 %v1155_v52, %v1145_v51  ;;  %v306_v10 = vstv %s2068_s28  ;;  %v1110_v14 = vmul.f32 %v1108_v37, %v1867_v5 }
  0x56   : > { %s2107_s27 = sld [smem:[#allocation5 + $0x2]]  ;;  %v303_v9 = vmul.f32 %v302_v63, %v1860_v4  ;;  %v316_v12 = vstv %s2073_s29  ;;  %v2119_v16 = vmul.f32 %v1888_v11, %v1124_v44  ;;  %v2126_v19 = vmul.f32 %v1900_v15, %v1136_v49 }
  0x57   : > { %1451 = vmatmul.msk.f32.vlgmr.msra.gmra.mxu2 %vm345_vm0, %v924_v50  ;;  %s2115_s6 = sld [smem:[#allocation5 + $0x3]]  ;;  %v317_v17 = vmul.f32 %v1874_v6, %v316_v12  ;;  %v328_v18 = vstv %s2077_s30  ;;  %v2132_v23 = vadd.f32 %v1137_v58, %v1127_v57  ;;  %v304_v27 = vmul.f32 %v302_v63, %v1867_v5 }
  0x58   : > { %s2123_s23 = sld [smem:[#allocation5 + $0x280]]  ;;  %v307_v20 = vadd.f32 %v306_v10, %v303_v9  ;;  %v329_v21 = vmul.f32 %v1881_v8, %v328_v18  ;;  %v340_v22 = vstv %s2083_s5  ;;  %v318_v35 = vmul.f32 %v1888_v11, %v316_v12 }
  0x59   : > { %s2130_s7 = sld [smem:[#allocation6 + $0x5]]  ;;  %v294_v24 = vstv %s2087_s8  ;;  %v341_v29 = vmul.f32 %v1894_v13, %v340_v22  ;;  %v308_v34 = vadd.f32 %v306_v10, %v304_v27  ;;  %v2150_v36 = vadd.f32 %v1144_v61, %v1134_v59 }
  0x5a   : > { %v298_v25 = vstv %s2090_s10  ;;  %s2137_s14 = sld [smem:[#allocation5 + $0x281]]  ;;  %v319_v28 = vadd.f32 %v317_v17, %v307_v20  ;;  %v295_v30 = vmul.f32 %v294_v24, %v1860_v4  ;;  %v330_v43 = vmul.f32 %v1900_v15, %v328_v18 }
  0x5b   : > { %v310_v31 = vstv %s2095_s13  ;;  %s2142_s11 = sld [smem:[#allocation5 + $0x282]]  ;;  %v320_v41 = vadd.f32 %v318_v35, %v308_v34  ;;  %v342_v44 = vmul.f32 %v1916_v26, %v340_v22  ;;  %v296_v48 = vmul.f32 %v294_v24, %v1867_v5 }
  0x5c   : > { %1453 = vmatmul.msk.f32.vlgmr.msra.gmra.mxu3 %vm345_vm0, %v918_v54  ;;  %v311_v32 = vmul.f32 %v1874_v6, %v310_v31  ;;  %v322_v33 = vstv %s2107_s27  ;;  %s2148_s12 = sld [smem:[#allocation5 + $0x283]]  ;;  %v331_v37 = vadd.f32 %v329_v21, %v319_v28  ;;  %v299_v38 = vadd.f32 %v298_v25, %v295_v30 }
  0x5d   : > { %v323_v39 = vmul.f32 %v1881_v8, %v322_v33  ;;  %s2153_s15 = sld [smem:[#allocation5 + $0x200]]  ;;  %v334_v40 = vstv %s2115_s6  ;;  %v1114_v49 = vadd.f32 %v1112_v42, %v1110_v14  ;;  %v332_v50 = vadd.f32 %v330_v43, %v320_v41 }
  0x5e   : > { %s2158_s24 = sld [smem:[#allocation6 + $0x4]]  ;;  %v343_v45 = vadd.f32 %v341_v29, %v331_v37  ;;  %v313_v46 = vadd.f32 %v311_v32, %v299_v38  ;;  %v335_v47 = vmul.f32 %v1894_v13, %v334_v40  ;;  %v312_v51 = vmul.f32 %v1888_v11, %v310_v31 }
  0x5f   : > { %1452 = vmatmul.msk.f32.gmra.mxu2 %vm345_vm0, %v925_v55  ;;  %s2163_s26 = sld [smem:[#allocation5 + $0x201]]  ;;  %v324_v52 = vmul.f32 %v1900_v15, %v322_v33  ;;  %v300_v55 = vadd.f32 %v298_v25, %v296_v48  ;;  %v537_v57 = vstv %s2123_s23  ;;  %v541_v58 = vstv %s2130_s7 }
  0x60   : > { %s2169_s28 = sld [smem:[#allocation5 + $0x202]]  ;;  %1375 = vmatmul.msk.f32.vlgmr.msra.gmra.mxu0 %vm345_vm0, %v343_v45  ;;  %v325_v54 = vadd.f32 %v323_v39, %v313_v46  ;;  %v336_v42 = vmul.f32 %v1916_v26, %v334_v40  ;;  %v538_v59 = vmul.f32 %v537_v57, %v1860_v4  ;;  %v551_v61 = vstv %s2137_s14 }
  0x61   : > { %s2174_s29 = sld [smem:[#allocation5 + $0x203]]  ;;  %v563_v63 = vstv %s2142_s11  ;;  %833 = vmatpush.msra.mxu0 %v1830_v0  ;;  %v344_v10 = vadd.f32 %v342_v44, %v332_v50  ;;  %v314_v12 = vadd.f32 %v312_v51, %v300_v55  ;;  %v552_v14 = vmul.f32 %v1874_v6, %v551_v61 }
  0x62   : > { %v337_v9 = vadd.f32 %v335_v47, %v325_v54  ;;  %s2182_s22 = sld [smem:[#allocation5 + $0x480]]  ;;  %v542_v17 = vadd.f32 %v541_v58, %v538_v59  ;;  %v575_v18 = vstv %s2148_s12  ;;  %v564_v24 = vmul.f32 %v1881_v8, %v563_v63 }
  0x63   : > { %v529_v20 = vstv %s2153_s15  ;;  %834 = vmatpush.msra.mxu0 %v1840_v2  ;;  %v326_v22 = vadd.f32 %v324_v52, %v314_v12  ;;  %s2194_s30 = sld [smem:[#allocation6 + $0x9]]  ;;  %v539_v30 = vmul.f32 %v537_v57, %v1867_v5  ;;  %v1151_v31 = vadd.f32 %v2100_v60, %v2132_v23 }
  0x64   : > { %1454 = vmatmul.msk.f32.gmra.mxu3 %vm345_vm0, %v2092_v56  ;;  %v533_v21 = vstv %s2158_s24  ;;  %1377 = vmatmul.msk.f32.vlgmr.msra.gmra.mxu1 %vm345_vm0, %v337_v9  ;;  %v530_v25 = vmul.f32 %v529_v20, %v1860_v4  ;;  %v554_v28 = vadd.f32 %v552_v14, %v542_v17  ;;  %s2200_s5 = sld [smem:[#allocation5 + $0x481]]  ;;  %v1128_v32 = vadd.f32 %v2119_v16, %v1114_v49 }
  0x65   : > { %v545_v27 = vstv %s2163_s26  ;;  %862 = vmatpush.msra.mxu1 %v1835_v1  ;;  %v576_v33 = vmul.f32 %v1894_v13, %v575_v18  ;;  %s2208_s8 = sld [smem:[#allocation5 + $0x400]]  ;;  %v543_v38 = vadd.f32 %v541_v58, %v539_v30  ;;  %v553_v39 = vmul.f32 %v1888_v11, %v551_v61 }
  0x66   : > { %v546_v56 = vmul.f32 %v1874_v6, %v545_v27  ;;  %v557_v29 = vstv %s2169_s28  ;;  %v534_v34 = vadd.f32 %v533_v21, %v530_v25  ;;  %s2214_s10 = sld [smem:[#allocation5 + $0x482]]  ;;  %v338_v60 = vadd.f32 %v336_v42, %v326_v22 }
  0x67   : > { %1483 = vmatmul.msk.f32.vlgmr.msrb.gmra.mxu2 %vm345_vm0, %v2110_v7  ;;  %v558_v35 = vmul.f32 %v1881_v8, %v557_v29  ;;  %v569_v37 = vstv %s2174_s29  ;;  %863 = vmatpush.msra.mxu1 %v1847_v3  ;;  %v566_v7 = vadd.f32 %v564_v24, %v554_v28  ;;  %v531_v23 = vmul.f32 %v529_v20, %v1867_v5  ;;  %s2218_s13 = sld [smem:[#allocation6 + $0x8]] }
  0x68   : > { %1376 = vmatmul.msk.f32.gmra.mxu0 %vm345_vm0, %v344_v10  ;;  %v548_v16 = vadd.f32 %v546_v56, %v534_v34  ;;  %v1158_v40 = vadd.f32 %v2104_v62, %v2150_v36  ;;  %v1150_v41 = vmul.f32 %v1916_v26, %v1148_v53  ;;  %s2225_s27 = sld [smem:[#allocation5 + $0x401]]  ;;  %v1140_v43 = vadd.f32 %v2126_v19, %v1128_v32 }
  0x69   : > { %v570_v44 = vmul.f32 %v1894_v13, %v569_v37  ;;  %v565_v45 = vmul.f32 %v1900_v15, %v563_v63  ;;  %v770_v46 = vstv %s2182_s22  ;;  %v555_v48 = vadd.f32 %v553_v39, %v543_v38  ;;  %s2233_s25 = sld [smem:[#allocation5 + $0x483]] }
  0x6a   : > { %v560_v47 = vadd.f32 %v558_v35, %v548_v16  ;;  %v535_v62 = vadd.f32 %v533_v21, %v531_v23  ;;  %v547_v36 = vmul.f32 %v1888_v11, %v545_v27  ;;  %v578_v53 = vadd.f32 %v576_v33, %v566_v7  ;;  %s2239_s6 = sld [smem:[#allocation5 + $0x402]] }
  0x6b   : > { %v771_v19 = vmul.f32 %v770_v46, %v1860_v4  ;;  %v774_v49 = vstv %s2194_s30  ;;  %v784_v50 = vstv %s2200_s5  ;;  %v1152_v51 = vadd.f32 %v1150_v41, %v1140_v43  ;;  %s2251_s23 = sld [smem:[#allocation5 + $0x403]]  ;;  %s1696_s30 = smov 32  }
  0x6c   : > { %1485 = vmatmul.msk.f32.vlgmr.msrb.gmra.mxu3 %vm345_vm0, %v1151_v31  ;;  %1378 = vmatmul.msk.f32.gmra.mxu1 %vm345_vm0, %v338_v60  ;;  %v577_v52 = vmul.f32 %v1916_v26, %v575_v18  ;;  %v762_v54 = vstv %s2208_s8  ;;  %v572_v55 = vadd.f32 %v570_v44, %v560_v47  ;;  %v567_v57 = vadd.f32 %v565_v45, %v555_v48  ;;  %s2282_s7 = sld [smem:[#allocation5 + $0x680]]  ;;  %s1492_s5 = sshll.u32 %s2414_s18, 6 }
  0x6d   : > { %v549_v58 = vadd.f32 %v547_v36, %v535_v62  ;;  %v559_v42 = vmul.f32 %v1900_v15, %v557_v29  ;;  %v775_v59 = vadd.f32 %v774_v49, %v771_v19  ;;  %v785_v61 = vmul.f32 %v1874_v6, %v784_v50  ;;  %s2284_s14 = sld [smem:[#allocation6 + $0xd]] }
  0x6e   : > { %v796_v63 = vstv %s2214_s10  ;;  %v763_v9 = vmul.f32 %v762_v54, %v1860_v4  ;;  %v766_v10 = vstv %s2218_s13  ;;  %v778_v12 = vstv %s2225_s27  ;;  %s2286_s11 = sld [smem:[#allocation5 + $0x681]]  ;;  %s2342_s13 = scalar_lea.vmem %s2401_s4, %s1492_s5 }
  0x6f   : > { %1484 = vmatmul.msk.f32.gmra.mxu2 %vm345_vm0, %v1158_v40  ;;  %v579_v14 = vadd.f32 %v577_v52, %v567_v57  ;;  %v571_v17 = vmul.f32 %v1916_v26, %v569_v37  ;;  %v797_v18 = vmul.f32 %v1881_v8, %v796_v63  ;;  %v808_v20 = vstv %s2233_s25  ;;  %s2288_s12 = sld [smem:[#allocation5 + $0x600]] }
  0x70   : > { %1403 = vmatmul.msk.f32.vlgmr.msrb.gmra.mxu0 %vm345_vm0, %v578_v53  ;;  %v561_v21 = vadd.f32 %v559_v42, %v549_v58  ;;  %v787_v22 = vadd.f32 %v785_v61, %v775_v59  ;;  %v767_v24 = vadd.f32 %v766_v10, %v763_v9  ;;  %v779_v25 = vmul.f32 %v1874_v6, %v778_v12  ;;  %s2290_s15 = sld [smem:[#allocation6 + $0xc]] }
  0x71   : > { %1066 = vmatpush.msrb.mxu0 %v1830_v0  ;;  %v790_v27 = vstv %s2239_s6  ;;  %v809_v0 = vmul.f32 %v1894_v13, %v808_v20  ;;  %v802_v30 = vstv %s2251_s23  ;;  %v764_v34 = vmul.f32 %v762_v54, %v1867_v5  ;;  %s2292_s24 = sld [smem:[#allocation5 + $0x601]] }
  0x72   : > { %v573_v28 = vadd.f32 %v571_v17, %v561_v21  ;;  %v799_v56 = vadd.f32 %v797_v18, %v787_v22  ;;  %v781_v29 = vadd.f32 %v779_v25, %v767_v24  ;;  %v803_v33 = vmul.f32 %v1894_v13, %v802_v30  ;;  %s2294_s26 = sld [smem:[#allocation5 + $0x682]] }
  0x73   : > { %1067 = vmatpush.msrb.mxu0 %v1840_v2  ;;  %v791_v2 = vmul.f32 %v1881_v8, %v790_v27  ;;  %v786_v37 = vmul.f32 %v1888_v11, %v784_v50  ;;  %v768_v38 = vadd.f32 %v766_v10, %v764_v34  ;;  %v780_v39 = vmul.f32 %v1888_v11, %v778_v12  ;;  %s2296_s28 = sld [smem:[#allocation5 + $0x602]] }
  0x74   : > { %1486 = vmatmul.msk.f32.gmra.mxu3 %vm345_vm0, %v1152_v51  ;;  %1405 = vmatmul.msk.f32.vlgmr.msrb.gmra.mxu1 %vm345_vm0, %v572_v55  ;;  %v811_v31 = vadd.f32 %v809_v0, %v799_v56  ;;  %v798_v7 = vmul.f32 %v1900_v15, %v796_v63  ;;  %v792_v23 = vmul.f32 %v1900_v15, %v790_v27  ;;  %s2298_s29 = sld [smem:[#allocation5 + $0x683]]  ;;  %v1003_v47 = vstv %s2282_s7 }
  0x75   : > { %1095 = vmatpush.msrb.mxu1 %v1835_v1  ;;  %v793_v32 = vadd.f32 %v791_v2, %v781_v29  ;;  %v782_v16 = vadd.f32 %v780_v39, %v768_v38  ;;  %v810_v41 = vmul.f32 %v1916_v26, %v808_v20  ;;  %v804_v44 = vmul.f32 %v1916_v26, %v802_v30  ;;  %s2300_s22 = sld [smem:[#allocation5 + $0x603]] }
  0x76   : > { %v995_v48 = vstv %s2288_s12  ;;  %v1004_v36 = vmul.f32 %v1003_v47, %v1860_v4  ;;  %v1007_v19 = vstv %s2284_s14  ;;  %v999_v50 = vstv %s2290_s15 }
  0x77   : > { %1096 = vmatpush.msrb.mxu1 %v1847_v3  ;;  %v805_v1 = vadd.f32 %v803_v33, %v793_v32  ;;  %v772_v3 = vmul.f32 %v770_v46, %v1867_v5  ;;  %v794_v43 = vadd.f32 %v792_v23, %v782_v16  ;;  %v996_v53 = vmul.f32 %v995_v48, %v1860_v4 }
  0x78   : > { %1404 = vmatmul.msk.f32.gmra.mxu0 %vm345_vm0, %v579_v14  ;;  %v1011_v51 = vstv %s2292_s24  ;;  %v1008_v52 = vadd.f32 %v1007_v19, %v1004_v36  ;;  %v1029_v58 = vstv %s2294_s26  ;;  %v1005_v24 = vmul.f32 %v1003_v47, %v1867_v5 }
  0x79   : > { %v776_v35 = vadd.f32 %v774_v49, %v772_v3  ;;  %v806_v46 = vadd.f32 %v804_v44, %v794_v43  ;;  %v1017_v49 = vstv %s2286_s11  ;;  %v1000_v55 = vadd.f32 %v999_v50, %v996_v53 }
  0x7a   : > { %v1018_v54 = vmul.f32 %v1874_v6, %v1017_v49  ;;  %v1012_v57 = vmul.f32 %v1874_v6, %v1011_v51  ;;  %v1023_v42 = vstv %s2296_s28  ;;  %v1030_v61 = vmul.f32 %v1881_v8, %v1029_v58 }
  0x7b   : > { %v788_v60 = vadd.f32 %v786_v37, %v776_v35  ;;  %v1024_v4 = vmul.f32 %v1881_v8, %v1023_v42  ;;  %v1041_v10 = vstv %s2298_s29  ;;  %v1035_v12 = vstv %s2300_s22 }
  0x7c   : > { %1406 = vmatmul.msk.f32.gmra.mxu1 %vm345_vm0, %v573_v28  ;;  %v1020_v59 = vadd.f32 %v1018_v54, %v1008_v52  ;;  %v1014_v63 = vadd.f32 %v1012_v57, %v1000_v55  ;;  %v1042_v18 = vmul.f32 %v1894_v13, %v1041_v10  ;;  %v1036_v21 = vmul.f32 %v1894_v13, %v1035_v12 }
  0x7d   : > { %v800_v40 = vadd.f32 %v798_v7, %v788_v60  ;;  %v997_v25 = vmul.f32 %v995_v48, %v1867_v5  ;;  %v1009_v27 = vadd.f32 %v1007_v19, %v1005_v24  ;;  %v1019_v0 = vmul.f32 %v1888_v11, %v1017_v49 }
  0x7e   : > { %v1032_v17 = vadd.f32 %v1030_v61, %v1020_v59  ;;  %v1026_v20 = vadd.f32 %v1024_v4, %v1014_v63  ;;  %v1013_v56 = vmul.f32 %v1888_v11, %v1011_v51  ;;  %v1031_v29 = vmul.f32 %v1900_v15, %v1029_v58 }
  0x7f   : > { %v812_v45 = vadd.f32 %v810_v41, %v800_v40  ;;  %v1001_v28 = vadd.f32 %v999_v50, %v997_v25  ;;  %v1021_v13 = vadd.f32 %v1019_v0, %v1009_v27  ;;  %v1025_v30 = vmul.f32 %v1900_v15, %v1023_v42 }
  0x80   : > { %1435 = vmatmul.msk.f32.vlgmr.msra.gmra.mxu0 %vm345_vm0, %v811_v31  ;;  %v1044_v22 = vadd.f32 %v1042_v18, %v1032_v17  ;;  %v1038_v8 = vadd.f32 %v1036_v21, %v1026_v20  ;;  %v1043_v33 = vmul.f32 %v1916_v26, %v1041_v10  ;;  %v1037_v3 = vmul.f32 %v1916_v26, %v1035_v12 }
  0x81   : > { %v1015_v2 = vadd.f32 %v1013_v56, %v1001_v28  ;;  %v1033_v5 = vadd.f32 %v1031_v29, %v1021_v13 }
  0x83   : > { %v1045_v34 = vadd.f32 %v1043_v33, %v1033_v5 }
  0x84   : > { %1437 = vmatmul.msk.f32.vlgmr.msra.gmra.mxu1 %vm345_vm0, %v805_v1  ;;  %v1027_v1 = vadd.f32 %v1025_v30, %v1015_v2 }
  0x86   : > { %v1039_v35 = vadd.f32 %v1037_v3, %v1027_v1 }
  0x88   : > { %1436 = vmatmul.msk.f32.gmra.mxu0 %vm345_vm0, %v812_v45 }
  0x8c   : > { %1438 = vmatmul.msk.f32.gmra.mxu1 %vm345_vm0, %v806_v46 }
  0x90   : > { %1467 = vmatmul.msk.f32.vlgmr.msrb.gmra.mxu0 %vm345_vm0, %v1044_v22 }
  0x94   : > { %1469 = vmatmul.msk.f32.vlgmr.msrb.gmra.mxu1 %vm345_vm0, %v1038_v8 }
  0x98   : > { %1468 = vmatmul.msk.f32.gmra.mxu0 %vm345_vm0, %v1045_v34 }
  0x9c   : > { %1470 = vmatmul.msk.f32.gmra.mxu1 %vm345_vm0, %v1039_v35 }
  0xba   : > { %v482_v62 = vpop.f32.mrf.mxu2 }
  0xbf   : > { %v511_v9 = vpop.f32.mrf.mxu3 }
  0xc0   : > { %v512_v14 = vadd.f32 %v511_v9, %v482_v62 }
  0xc2   : > { %519 = vrot.lane.b32.xlu0 %v512_v14, %s1696_s30  ;;  %v485_v6 = vpop.f32.mrf.mxu2 }
  0xc7   : > { %v514_v31 = vpop.f32.mrf.mxu3 }
  0xc8   : > { %v515_v32 = vadd.f32 %v514_v31, %v485_v6 }
  0xca   : > { %521 = vrot.lane.b32.xlu0 %v515_v32, %s1696_s30  ;;  %v716_v11 = vpop.f32.mrf.mxu2 }
  0xcf   : > { %v745_v15 = vpop.f32.mrf.mxu3 }
  0xd0   : > { %v746_v37 = vadd.f32 %v745_v15, %v716_v11 }
  0xd2   : > { %753 = vrot.lane.b32.xlu1 %v746_v37, %s1696_s30  ;;  %v719_v38 = vpop.f32.mrf.mxu2 }
  0xd7   : > { %v748_v39 = vpop.f32.mrf.mxu3 }
  0xd8   : > { %v749_v60 = vadd.f32 %v748_v39, %v719_v38 }
  0xda   : > { %755 = vrot.lane.b32.xlu1 %v749_v60, %s1696_s30  ;;  %v949_v26 = vpop.f32.mrf.mxu2 }
  0xdd   : > { %v369_v7 = vpop.f32.mrf.mxu0 }
  0xdf   : > { %v978_v16 = vpop.f32.mrf.mxu3 }
  0xe0   : > { %v979_v23 = vadd.f32 %v978_v16, %v949_v26 }
  0xe1   : > { %v398_v41 = vpop.f32.mrf.mxu1 }
  0xe2   : > { %986 = vrot.lane.b32.xlu2 %v979_v23, %s1696_s30  ;;  %v952_v40 = vpop.f32.mrf.mxu2  ;;  %v399_v43 = vadd.f32 %v398_v41, %v369_v7 }
  0xe4   : > { %405 = vst.msk [vmem:[%s2342_s13] sm:$0xff] %vm404_vm1, %v399_v43 }
  0xe5   : > { %v372_v44 = vpop.f32.mrf.mxu0 }
  0xe7   : > { %v981_v45 = vpop.f32.mrf.mxu3 }
  0xe8   : > { %v982_v46 = vadd.f32 %v981_v45, %v952_v40 }
  0xe9   : > { %v401_v47 = vpop.f32.mrf.mxu1 }
  0xea   : > { %988 = vrot.lane.b32.xlu2 %v982_v46, %s1696_s30  ;;  %v1182_v48 = vpop.f32.mrf.mxu2  ;;  %v402_v62 = vadd.f32 %v401_v47, %v372_v44 }
  0xec   : > { %406 = vst.msk [vmem:[%s2342_s13 + $0x8] sm:$0xff] %vm404_vm1, %v402_v62 }
  0xed   : > { %v603_v19 = vpop.f32.mrf.mxu0 }
  0xef   : > { %v1211_v36 = vpop.f32.mrf.mxu3 }
  0xf0   : > { %v1212_v53 = vadd.f32 %v1211_v36, %v1182_v48 }
  0xf1   : > { %v632_v49 = vpop.f32.mrf.mxu1 }
  0xf2   : > { %1219 = vrot.lane.b32.xlu0 %v1212_v53, %s1696_s30  ;;  %v633_v50 = vadd.f32 %v632_v49, %v603_v19  ;;  %v1185_v51 = vpop.f32.mrf.mxu2 }
  0xf4   : > { %1407 = vst.msk [vmem:[%s2342_s13 + $0x10] sm:$0xff] %vm404_vm1, %v633_v50 }
  0xf5   : > { %v606_v55 = vpop.f32.mrf.mxu0 }
  0xf7   : > { %v1214_v52 = vpop.f32.mrf.mxu3 }
  0xf8   : > { %v1215_v54 = vadd.f32 %v1214_v52, %v1185_v51 }
  0xf9   : > { %v635_v57 = vpop.f32.mrf.mxu1 }
  0xfa   : > { %1221 = vrot.lane.b32.xlu1 %v1215_v54, %s1696_s30  ;;  %v636_v58 = vadd.f32 %v635_v57, %v606_v55 }
  0xfc   : > { %1408 = vst.msk [vmem:[%s2342_s13 + $0x18] sm:$0xff] %vm404_vm1, %v636_v58 }
  0xfd   : > { %v836_v42 = vpop.f32.mrf.mxu0 }
 0x101   : > { %v865_v59 = vpop.f32.mrf.mxu1 }
 0x102   : > { %v866_v61 = vadd.f32 %v865_v59, %v836_v42 }
 0x104   : > { %1439 = vst.msk [vmem:[%s2342_s13 + $0x20] sm:$0xff] %vm404_vm1, %v866_v61 }
 0x105   : > { %v839_v63 = vpop.f32.mrf.mxu0 }
 0x109   : > { %v868_v4 = vpop.f32.mrf.mxu1 }
 0x10a   : > { %v869_v9 = vadd.f32 %v868_v4, %v839_v63 }
 0x10c   : > { %1440 = vst.msk [vmem:[%s2342_s13 + $0x28] sm:$0xff] %vm404_vm1, %v869_v9 }
 0x10d   : > { %v1069_v17 = vpop.f32.mrf.mxu0 }
 0x111   : > { %v1098_v18 = vpop.f32.mrf.mxu1 }
 0x112   : > { %v1099_v20 = vadd.f32 %v1098_v18, %v1069_v17 }
 0x114   : > { %1471 = vst.msk [vmem:[%s2342_s13 + $0x30] sm:$0xff] %vm404_vm1, %v1099_v20 }
 0x115   : > { %v1072_v22 = vpop.f32.mrf.mxu0 }
 0x119   : > { %v1101_v24 = vpop.f32.mrf.mxu1 }
 0x11a   : > { %v1102_v25 = vadd.f32 %v1101_v24, %v1072_v22 }
 0x11c   : > { %1472 = vst.msk [vmem:[%s2342_s13 + $0x38] sm:$0xff] %vm404_vm1, %v1102_v25 }
 0x134   : > { %v520_v10 = vpop.permute.xlu0 %519 }
 0x135   : > { %526 = vst.msk [vmem:[%s2342_s13] sm:$0xff] %vm525_vm2, %v520_v10 }
 0x13c   : > { %v987_v12 = vpop.permute.xlu2 %986  ;;  %v522_v14 = vpop.permute.xlu0 %521 }
 0x13d   : > { %1455 = vst.msk [vmem:[%s2342_s13 + $0x20] sm:$0xff] %vm525_vm2, %v987_v12 }
 0x13e   : > { %527 = vst.msk [vmem:[%s2342_s13 + $0x8] sm:$0xff] %vm525_vm2, %v522_v14 }
 0x144   : > { %v989_v21 = vpop.permute.xlu2 %988  ;;  %v754_v6 = vpop.permute.xlu1 %753 }
 0x145   : > { %1456 = vst.msk [vmem:[%s2342_s13 + $0x28] sm:$0xff] %vm525_vm2, %v989_v21 }
 0x146   : > { %1423 = vst.msk [vmem:[%s2342_s13 + $0x10] sm:$0xff] %vm525_vm2, %v754_v6 }
 0x14c   : > { %v756_v8 = vpop.permute.xlu1 %755 }
 0x14d   : > { %1424 = vst.msk [vmem:[%s2342_s13 + $0x18] sm:$0xff] %vm525_vm2, %v756_v8 }
 0x164   : > { %v1220_v27 = vpop.permute.xlu0 %1219 }
 0x165   : > { %1487 = vst.msk [vmem:[%s2342_s13 + $0x30] sm:$0xff] %vm525_vm2, %v1220_v27 }
 0x16c   : > { %v1222_v0 = vpop.permute.xlu1 %1221 }
 0x16d   : > { %1488 = vst.msk [vmem:[%s2342_s13 + $0x38] sm:$0xff] %vm525_vm2, %v1222_v0 }
 0x16e PF: > { %s19_s20 = sadd.s32 1, %s1690_s20   ;;  %s2406_s15 = smov %s1674_s16 }
 0x16f   : > { %p16_p2 = scmp.ge.s32.totalorder %s19_s20, 4   ;;  %s2407_s16 = smov %s1678_s17 }
 0x170   : > { %s2408_s17 = smov %s1798_s21  ;;  %s2409_s18 = smov %s1686_s19 }
 0x171   : > { %s2410_s19 = smov %s2412_s9  ;;  %18 = sbr.rel (!%p16_p2) target bundleno = 6 (0x6), region = 92 }
 0x176   :  { %1257 = vsyncpa [#allocation3], 1 }
 0x177   :  { %1259 = vsyncpa [#allocation3 + $0x1], 1 }
 0x178   :  { %1260 = vsyncpa [#allocation4], 1 }
 0x179   :  { %1262 = vsyncpa [#allocation4 + $0x1], 1 }
 0x17a   :  { %1263 = vsyncpa [#allocation7], 1 }

</bundles_post_ra>
